<compile_context>
chip_gen: v5e
topology: v5e:2x2
jax: 0.10.0
libtpu: 0.0.40
codegen_flags: <defaults>
</compile_context>

<pallas_src>
from typing import NamedTuple, Optional

import jax
import jax.numpy as jnp
from jax.experimental import pallas as pl
from jax.experimental.pallas import tpu as pltpu


def _round_up(x, m):
    return (x + m - 1) // m * m


def _pick_lane_tile(dim, max_tile=512):
    """Lane-dim tile (multiple of 128) that divides the 128-padded dim exactly."""
    dpad = _round_up(dim, 128)
    if dpad <= max_tile:
        return dpad
    t = max_tile - (max_tile % 128)
    while t >= 128:
        if dpad % t == 0:
            return t
        t -= 128
    return 128


def _pick_tm(m, max_tile=512):
    """Sublane-dim tile (multiple of 8) dividing the 8-padded M exactly.

    When a single block would cover all of M, split into two blocks (if M is
    large enough to make both substantial) so the v7x megacore "parallel"
    i-axis actually feeds both TensorCores.
    """
    mp = _round_up(m, 8)
    if mp <= max_tile:
        if mp >= 256 and mp % 16 == 0:
            return mp // 2
        return mp
    t = max_tile - (max_tile % 8)
    while t >= 8:
        if mp % t == 0:
            return t
        t -= 8
    return 8


def _lora_linear_kernel(x_ref, wt_ref, b_ref, a_ref, bs_ref, o_ref,
                        acc_ref, mid_ref):
    # x_ref  : (tm, tk)        activation tile
    # wt_ref : (tk, tn)        pre-transposed frozen weight tile (W.T)
    # b_ref  : (1,  tn)        frozen bias tile
    # a_ref  : (tk, r_pad)     pre-transposed lora_A (A.T), zero lane-padded
    # bs_ref : (r_pad, tn)     pre-transposed, pre-scaled lora_B ((alpha/r)*B).T
    # o_ref  : (tm, tn)        output tile
    # acc_ref: (tm, tn) f32    main GEMM accumulator (scratch)
    # mid_ref: (tm, r_pad) f32 LoRA intermediate x @ A.T (scratch, reused over j)
    j = pl.program_id(1)
    k = pl.program_id(2)
    nk = pl.num_programs(2)

    # Initialize the accumulator with the broadcast bias (saves an epilogue add).
    @pl.when(k == 0)
    def _init_acc():
        acc_ref[...] = jnp.broadcast_to(b_ref[...].astype(jnp.float32),
                                        acc_ref.shape)

    @pl.when(jnp.logical_and(j == 0, k == 0))
    def _init_mid():
        mid_ref[...] = jnp.zeros_like(mid_ref)

    x = x_ref[...]

    # Main GEMM partial product (MXU), f32 accumulation.
    acc_ref[...] += jnp.dot(x, wt_ref[...], preferred_element_type=jnp.float32)

    # LoRA intermediate depends only on (i, k): build it once per M tile during
    # the first N tile's K sweep and reuse it for all other N tiles.
    @pl.when(j == 0)
    def _mid():
        mid_ref[...] += jnp.dot(x, a_ref[...],
                                preferred_element_type=jnp.float32)

    # Rank-r LoRA apply: for j == 0 it must wait until mid is complete (last k);
    # for j > 0 mid is already complete, so issue it at k == 0 where there is
    # slack instead of doubling the final k step's MXU work.
    apply_lora = jnp.logical_or(jnp.logical_and(j == 0, k == nk - 1),
                                jnp.logical_and(j > 0, k == 0))

    @pl.when(apply_lora)
    def _lora():
        # Feed the MXU in the weight dtype (bf16 path when the model is bf16);
        # keep the f32 accumulate via preferred_element_type.
        acc_ref[...] += jnp.dot(mid_ref[...].astype(bs_ref.dtype), bs_ref[...],
                                preferred_element_type=jnp.float32)

    @pl.when(k == nk - 1)
    def _store():
        o_ref[...] = acc_ref[...].astype(o_ref.dtype)


class LoRAPrepared(NamedTuple):
    Wt: jax.Array   # (Kp, Np)     W.T, zero-padded
    b2: jax.Array   # (1,  Np)     bias, zero-padded
    At: jax.Array   # (Kp, r_pad)  lora_A.T, zero-padded
    Bs: jax.Array   # (r_pad, Np)  (alpha/r) * lora_B.T, zero-padded
    K: int
    N: int
    tk: int
    tn: int
    r_pad: int


def prepare_lora_adapter(W, b, lora_A, lora_B, *, lora_alpha, r,
                         tn: Optional[int] = None, tk: Optional[int] = None,
                         max_tile: int = 512):
    """One-time layout prep of the frozen weights + LoRA factors.

    In a real adapter this is done (and cached) at construction time so the
    per-forward path never re-materializes transposed/padded weights in HBM.
    """
    N, K = W.shape
    assert lora_A.shape == (r, K) and lora_B.shape == (N, r)
    scaling = float(lora_alpha) / float(r)

    tn = _pick_lane_tile(N, max_tile) if tn is None else tn
    tk = _pick_lane_tile(K, max_tile) if tk is None else tk
    Kp, Np = _round_up(K, tk), _round_up(N, tn)
    r_pad = _round_up(max(r, 1), 128)   # lane-pad the LoRA rank

    Wt = jnp.pad(W.T, ((0, Kp - K), (0, Np - N)))                      # (Kp, Np)
    b2 = jnp.pad(b.reshape(1, N), ((0, 0), (0, Np - N)))               # (1,  Np)
    At = jnp.pad(lora_A.T, ((0, Kp - K), (0, r_pad - r)))              # (Kp, r_pad)
    Bs = jnp.pad((lora_B * scaling).T, ((0, r_pad - r), (0, Np - N)))  # (r_pad, Np)
    return LoRAPrepared(Wt, b2, At, Bs, K, N, tk, tn, r_pad)


def lora_adapter_apply(x, prep: LoRAPrepared, *, tm: Optional[int] = None,
                       max_tile: int = 512):
    """x: (..., in_features) -> (..., out_features)."""
    *lead, K = x.shape
    assert K == prep.K
    M = 1
    for d in lead:
        M *= d

    tk, tn, r_pad = prep.tk, prep.tn, prep.r_pad
    Kp, Np = prep.Wt.shape
    tm = _pick_tm(M, max_tile) if tm is None else tm
    Mp = _round_up(M, tm)

    x2 = jnp.pad(x.reshape(M, K), ((0, Mp - M), (0, Kp - K)))
    grid = (Mp // tm, Np // tn, Kp // tk)

    # Double-buffered VMEM footprint estimate -> explicit limit (v7x: 64 MiB).
    itemsize = max(x.dtype.itemsize, prep.Wt.dtype.itemsize)
    vmem_bytes = (2 * (tm * tk + tk * tn + tn + tk * r_pad + r_pad * tn
                       + tm * tn) * itemsize
                  + (tm * tn + tm * r_pad) * 4)
    vmem_limit = int(min(64 << 20, max(32 << 20, 2 * vmem_bytes)))

    out_padded = pl.pallas_call(
        _lora_linear_kernel,
        out_shape=jax.ShapeDtypeStruct((Mp, Np), x.dtype),
        grid_spec=pltpu.PrefetchScalarGridSpec(
            num_scalar_prefetch=0,
            grid=grid,
            in_specs=[
                pl.BlockSpec((tm, tk), lambda i, j, k: (i, k)),        # x
                pl.BlockSpec((tk, tn), lambda i, j, k: (k, j)),        # W.T
                pl.BlockSpec((1, tn), lambda i, j, k: (0, j)),         # bias
                # A.T is only read on the j == 0 sweep; gate the block index so
                # Pallas does not re-stream a dead (tk, r_pad) tile on j > 0.
                pl.BlockSpec((tk, r_pad),
                             lambda i, j, k: (jnp.where(j == 0, k, 0), 0)),
                pl.BlockSpec((r_pad, tn), lambda i, j, k: (0, j)),     # (a/r)*B.T
            ],
            out_specs=pl.BlockSpec((tm, tn), lambda i, j, k: (i, j)),
            scratch_shapes=[
                pltpu.VMEM((tm, tn), jnp.float32),     # main accumulator
                pltpu.VMEM((tm, r_pad), jnp.float32),  # LoRA intermediate
            ],
        ),
        compiler_params=pltpu.CompilerParams(
            # i (M) is parallel -> megacore sharding on v7x; j (N) MUST stay
            # sequential so the hoisted `mid` scratch is valid; k is reduction.
            dimension_semantics=("parallel", "arbitrary", "arbitrary"),
            vmem_limit_bytes=vmem_limit),
    )(x2, prep.Wt, prep.b2, prep.At, prep.Bs)

    return out_padded[:M, :prep.N].reshape(*lead, prep.N)


def lora_adapter_forward(x, W, b, lora_A, lora_B, *, lora_alpha, r,
                         tm=None, tn=None, tk=None):
    """Convenience wrapper. In steady-state usage call prepare_lora_adapter()
    once (weights are frozen) and reuse the prepared layout across forwards."""
    prep = prepare_lora_adapter(W, b, lora_A, lora_B,
                                lora_alpha=lora_alpha, r=r, tn=tn, tk=tk)
    return lora_adapter_apply(x, prep, tm=tm)


def lora_adapter_reference(x, W, b, lora_A, lora_B, *, lora_alpha, r):
    scaling = float(lora_alpha) / float(r)
    hp = jax.lax.Precision.HIGHEST
    original = jnp.einsum("bsk,nk->bsn", x, W, precision=hp) + b
    mid = jnp.einsum("bsk,rk->bsr", x, lora_A, precision=hp)
    lora = jnp.einsum("bsr,nr->bsn", mid, lora_B, precision=hp)
    return original + lora * scaling


def _run_case(key, batch, seq, in_features, out_features, r, lora_alpha,
              tm=None, tn=None, tk=None):
    kx, kw, kb, ka, kbb = jax.random.split(key, 5)
    x = jax.random.normal(kx, (batch, seq, in_features), dtype=jnp.float32)
    # Frozen existing Linear parameters (deterministic synthetic init).
    W = jax.random.normal(kw, (out_features, in_features), jnp.float32) * 0.05
    b = jax.random.normal(kb, (out_features,), jnp.float32) * 0.01
    # lora_A: normal(0, 0.02), exactly as reset_parameters() does.
    lora_A = jax.random.normal(ka, (r, in_features), jnp.float32) * 0.02
    # lora_B is zero-initialized in the module; use a nonzero deterministic
    # value here so the LoRA path is actually exercised.
    lora_B = jax.random.normal(kbb, (out_features, r), jnp.float32) * 0.02

    out = lora_adapter_forward(x, W, b, lora_A, lora_B,
                               lora_alpha=lora_alpha, r=r, tm=tm, tn=tn, tk=tk)
    out = jax.block_until_ready(out)
    ref = lora_adapter_reference(x, W, b, lora_A, lora_B,
                                 lora_alpha=lora_alpha, r=r)

    assert out.shape == (batch, seq, out_features)
    err = jnp.max(jnp.abs(out - ref))
    assert jnp.allclose(out, ref, atol=2e-3, rtol=2e-3), f"max abs err {err}"


if __name__ == "__main__":
    key = jax.random.PRNGKey(0)
    k1, k2 = jax.random.split(key)

    # Case 1: explicit small tiles -> multi-block grid (2, 3, 2) to exercise
    # the tiled K reduction, the bias-initialized accumulator, the hoisted
    # LoRA mid reused across j > 0 tiles, and the lora-at-k==0 epilogue path.
    _run_case(k1, batch=2, seq=128, in_features=256, out_features=384,
              r=8, lora_alpha=16, tm=128, tn=128, tk=128)

    # Case 2: tiny module-scale shapes with auto-picked tiles; the wrapper
    # zero-pads up to a single (8, 128)-aligned block.
    _run_case(k2, batch=2, seq=8, in_features=32, out_features=48,
              r=4, lora_alpha=8)

    # TODO(synk): dropout is identity for lora_dropout=0.0 (module default);
    # a nonzero-p training-mode dropout would need pltpu.prng_* in the kernel.
    print("KERNEL_OK")
</pallas_src>

<mosaic_0001>
module attributes {stable_mosaic.version = 11 : i64} {
  func.func @_lora_linear_kernel(%arg0: i32, %arg1: i32, %arg2: i32, %arg3: memref<128x128xf32, #tpu.memory_space<vmem>>, %arg4: memref<128x128xf32, #tpu.memory_space<vmem>>, %arg5: memref<1x128xf32, #tpu.memory_space<vmem>>, %arg6: memref<128x128xf32, #tpu.memory_space<vmem>>, %arg7: memref<128x128xf32, #tpu.memory_space<vmem>>, %arg8: memref<128x128xf32, #tpu.memory_space<vmem>>, %arg9: memref<128x128xf32, #tpu.memory_space<vmem>>, %arg10: memref<128x128xf32, #tpu.memory_space<vmem>>) attributes {dimension_semantics = [#tpu.dimension_semantics<parallel>, #tpu.dimension_semantics<arbitrary>, #tpu.dimension_semantics<arbitrary>], iteration_bounds = array<i64: 2, 3, 2>, scalar_prefetch = 0 : i64, scratch_operands = 2 : i64, tpu.core_type = #tpu.core_type<tc>, window_params = [{transform_indices = @transform_0, window_bounds = array<i64: 128, 128>}, {transform_indices = @transform_1, window_bounds = array<i64: 128, 128>}, {transform_indices = @transform_2, window_bounds = array<i64: 1, 128>}, {transform_indices = @transform_3, window_bounds = array<i64: 128, 128>}, {transform_indices = @transform_4, window_bounds = array<i64: 128, 128>}, {transform_indices = @transform_5, window_bounds = array<i64: 128, 128>}]} {
    %c0_i32 = arith.constant 0 : i32
    %0 = arith.cmpi eq, %arg2, %c0_i32 : i32
    %1 = arith.extui %0 : i1 to i32
    %c0_i32_0 = arith.constant 0 : i32
    %2 = arith.cmpi ne, %1, %c0_i32_0 : i32
    scf.if %2 {
      %c0_19 = arith.constant 0 : index
      %c0_20 = arith.constant 0 : index
      %29 = vector.load %arg5[%c0_19, %c0_20] : memref<1x128xf32, #tpu.memory_space<vmem>>, vector<1x128xf32>
      %30 = vector.shape_cast %29 : vector<1x128xf32> to vector<1x128xf32>
      %31 = vector.broadcast %30 : vector<1x128xf32> to vector<128x128xf32>
      %c0_21 = arith.constant 0 : index
      %c0_22 = arith.constant 0 : index
      %32 = vector.load %arg9[%c0_21, %c0_22] : memref<128x128xf32, #tpu.memory_space<vmem>>, vector<128x128xf32>
      tpu.vector_store %arg9[%c0_21, %c0_22], %31 {strides = array<i32>} : memref<128x128xf32, #tpu.memory_space<vmem>>, vector<128x128xf32>,
    } else {
    }
    %c0_i32_1 = arith.constant 0 : i32
    %3 = arith.cmpi eq, %arg1, %c0_i32_1 : i32
    %c0_i32_2 = arith.constant 0 : i32
    %4 = arith.cmpi eq, %arg2, %c0_i32_2 : i32
    %5 = arith.andi %3, %4 : i1
    %6 = arith.extui %5 : i1 to i32
    %c0_i32_3 = arith.constant 0 : i32
    %7 = arith.cmpi ne, %6, %c0_i32_3 : i32
    scf.if %7 {
      %cst_19 = arith.constant 0.000000e+00 : f32
      %29 = vector.broadcast %cst_19 : f32 to vector<128x128xf32>
      %c0_20 = arith.constant 0 : index
      %c0_21 = arith.constant 0 : index
      %30 = vector.load %arg10[%c0_20, %c0_21] : memref<128x128xf32, #tpu.memory_space<vmem>>, vector<128x128xf32>
      tpu.vector_store %arg10[%c0_20, %c0_21], %29 {strides = array<i32>} : memref<128x128xf32, #tpu.memory_space<vmem>>, vector<128x128xf32>,
    } else {
    }
    %c0 = arith.constant 0 : index
    %c0_4 = arith.constant 0 : index
    %8 = vector.load %arg3[%c0, %c0_4] : memref<128x128xf32, #tpu.memory_space<vmem>>, vector<128x128xf32>
    %c0_5 = arith.constant 0 : index
    %c0_6 = arith.constant 0 : index
    %9 = vector.load %arg9[%c0_5, %c0_6] : memref<128x128xf32, #tpu.memory_space<vmem>>, vector<128x128xf32>
    %c0_7 = arith.constant 0 : index
    %c0_8 = arith.constant 0 : index
    %10 = vector.load %arg4[%c0_7, %c0_8] : memref<128x128xf32, #tpu.memory_space<vmem>>, vector<128x128xf32>
    %cst = arith.constant dense<0.000000e+00> : vector<128x128xf32>
    %11 = tpu.matmul %8, %10, %cst {dimension_numbers = #tpu.dot_dimension_numbers<[1], [0], [0], [1], [0, 0, 1, 1], [], []>} : vector<128x128xf32>, vector<128x128xf32>, vector<128x128xf32> -> vector<128x128xf32>
    %12 = arith.addf %9, %11 : vector<128x128xf32>
    %c0_9 = arith.constant 0 : index
    %c0_10 = arith.constant 0 : index
    %13 = vector.load %arg9[%c0_9, %c0_10] : memref<128x128xf32, #tpu.memory_space<vmem>>, vector<128x128xf32>
    tpu.vector_store %arg9[%c0_9, %c0_10], %12 {strides = array<i32>} : memref<128x128xf32, #tpu.memory_space<vmem>>, vector<128x128xf32>,
    %c0_i32_11 = arith.constant 0 : i32
    %14 = arith.cmpi eq, %arg1, %c0_i32_11 : i32
    %15 = arith.extui %14 : i1 to i32
    %c0_i32_12 = arith.constant 0 : i32
    %16 = arith.cmpi ne, %15, %c0_i32_12 : i32
    scf.if %16 {
      %c0_19 = arith.constant 0 : index
      %c0_20 = arith.constant 0 : index
      %29 = vector.load %arg10[%c0_19, %c0_20] : memref<128x128xf32, #tpu.memory_space<vmem>>, vector<128x128xf32>
      %c0_21 = arith.constant 0 : index
      %c0_22 = arith.constant 0 : index
      %30 = vector.load %arg6[%c0_21, %c0_22] : memref<128x128xf32, #tpu.memory_space<vmem>>, vector<128x128xf32>
      %cst_23 = arith.constant dense<0.000000e+00> : vector<128x128xf32>
      %31 = tpu.matmul %8, %30, %cst_23 {dimension_numbers = #tpu.dot_dimension_numbers<[1], [0], [0], [1], [0, 0, 1, 1], [], []>} : vector<128x128xf32>, vector<128x128xf32>, vector<128x128xf32> -> vector<128x128xf32>
      %32 = arith.addf %29, %31 : vector<128x128xf32>
      %c0_24 = arith.constant 0 : index
      %c0_25 = arith.constant 0 : index
      %33 = vector.load %arg10[%c0_24, %c0_25] : memref<128x128xf32, #tpu.memory_space<vmem>>, vector<128x128xf32>
      tpu.vector_store %arg10[%c0_24, %c0_25], %32 {strides = array<i32>} : memref<128x128xf32, #tpu.memory_space<vmem>>, vector<128x128xf32>,
    } else {
    }
    %c0_i32_13 = arith.constant 0 : i32
    %17 = arith.cmpi eq, %arg1, %c0_i32_13 : i32
    %c1_i32 = arith.constant 1 : i32
    %18 = arith.cmpi eq, %arg2, %c1_i32 : i32
    %19 = arith.andi %17, %18 : i1
    %c0_i32_14 = arith.constant 0 : i32
    %20 = arith.cmpi sgt, %arg1, %c0_i32_14 : i32
    %c0_i32_15 = arith.constant 0 : i32
    %21 = arith.cmpi eq, %arg2, %c0_i32_15 : i32
    %22 = arith.andi %20, %21 : i1
    %23 = arith.ori %19, %22 : i1
    %24 = arith.extui %23 : i1 to i32
    %c0_i32_16 = arith.constant 0 : i32
    %25 = arith.cmpi ne, %24, %c0_i32_16 : i32
    scf.if %25 {
      %c0_19 = arith.constant 0 : index
      %c0_20 = arith.constant 0 : index
      %29 = vector.load %arg9[%c0_19, %c0_20] : memref<128x128xf32, #tpu.memory_space<vmem>>, vector<128x128xf32>
      %c0_21 = arith.constant 0 : index
      %c0_22 = arith.constant 0 : index
      %30 = vector.load %arg10[%c0_21, %c0_22] : memref<128x128xf32, #tpu.memory_space<vmem>>, vector<128x128xf32>
      %c0_23 = arith.constant 0 : index
      %c0_24 = arith.constant 0 : index
      %31 = vector.load %arg7[%c0_23, %c0_24] : memref<128x128xf32, #tpu.memory_space<vmem>>, vector<128x128xf32>
      %cst_25 = arith.constant dense<0.000000e+00> : vector<128x128xf32>
      %32 = tpu.matmul %30, %31, %cst_25 {dimension_numbers = #tpu.dot_dimension_numbers<[1], [0], [0], [1], [0, 0, 1, 1], [], []>} : vector<128x128xf32>, vector<128x128xf32>, vector<128x128xf32> -> vector<128x128xf32>
      %33 = arith.addf %29, %32 : vector<128x128xf32>
      %c0_26 = arith.constant 0 : index
      %c0_27 = arith.constant 0 : index
      %34 = vector.load %arg9[%c0_26, %c0_27] : memref<128x128xf32, #tpu.memory_space<vmem>>, vector<128x128xf32>
      tpu.vector_store %arg9[%c0_26, %c0_27], %33 {strides = array<i32>} : memref<128x128xf32, #tpu.memory_space<vmem>>, vector<128x128xf32>,
    } else {
    }
    %c1_i32_17 = arith.constant 1 : i32
    %26 = arith.cmpi eq, %arg2, %c1_i32_17 : i32
    %27 = arith.extui %26 : i1 to i32
    %c0_i32_18 = arith.constant 0 : i32
    %28 = arith.cmpi ne, %27, %c0_i32_18 : i32
    scf.if %28 {
      %c0_19 = arith.constant 0 : index
      %c0_20 = arith.constant 0 : index
      %29 = vector.load %arg9[%c0_19, %c0_20] : memref<128x128xf32, #tpu.memory_space<vmem>>, vector<128x128xf32>
      %c0_21 = arith.constant 0 : index
      %c0_22 = arith.constant 0 : index
      %30 = vector.load %arg8[%c0_21, %c0_22] : memref<128x128xf32, #tpu.memory_space<vmem>>, vector<128x128xf32>
      tpu.vector_store %arg8[%c0_21, %c0_22], %29 {strides = array<i32>} : memref<128x128xf32, #tpu.memory_space<vmem>>, vector<128x128xf32>,
    } else {
    }
    return
  }
  func.func @transform_0(%arg0: i32, %arg1: i32, %arg2: i32) -> (i32, i32) {
    %c0_i32 = arith.constant 0 : i32
    return %arg0, %arg2 : i32, i32
  }
  func.func @transform_1(%arg0: i32, %arg1: i32, %arg2: i32) -> (i32, i32) {
    %c0_i32 = arith.constant 0 : i32
    return %arg2, %arg1 : i32, i32
  }
  func.func @transform_2(%arg0: i32, %arg1: i32, %arg2: i32) -> (i32, i32) {
    %c0_i32 = arith.constant 0 : i32
    %c0_i32_0 = arith.constant 0 : i32
    return %c0_i32, %arg1 : i32, i32
  }
  func.func @transform_3(%arg0: i32, %arg1: i32, %arg2: i32) -> (i32, i32) {
    %c0_i32 = arith.constant 0 : i32
    %0 = arith.cmpi eq, %arg1, %c0_i32 : i32
    %c0_i32_0 = arith.constant 0 : i32
    %1 = arith.select %0, %arg2, %c0_i32_0 : i32
    %c0_i32_1 = arith.constant 0 : i32
    %c0_i32_2 = arith.constant 0 : i32
    return %1, %c0_i32_1 : i32, i32
  }
  func.func @transform_4(%arg0: i32, %arg1: i32, %arg2: i32) -> (i32, i32) {
    %c0_i32 = arith.constant 0 : i32
    %c0_i32_0 = arith.constant 0 : i32
    return %c0_i32, %arg1 : i32, i32
  }
  func.func @transform_5(%arg0: i32, %arg1: i32, %arg2: i32) -> (i32, i32) {
    %c0_i32 = arith.constant 0 : i32
    return %arg0, %arg1 : i32, i32
  }
}

</mosaic_0001>

<bundles_post_ra>
// kernel: tpu_custom_call.1
= control target key start
LH: loop header
LB: loop body
LE: loop exit
PB: predicated region body
PF: predicated region fallthrough
CT: control target
= control target key end

     0   :  { %s2574_s0 = inlined_call_operand.hbm [shape: f32[256,256], index: 0, kind: input, shape index: {}]   ;;  %s2575_s1 = inlined_call_operand.hbm [shape: f32[256,384], index: 1, kind: input, shape index: {}]   ;;  %s2576_s2 = inlined_call_operand.hbm [shape: f32[1,384], index: 2, kind: input, shape index: {}]   ;;  %s2577_s3 = inlined_call_operand.hbm [shape: f32[256,128], index: 3, kind: input, shape index: {}]   ;;  %s2578_s4 = inlined_call_operand.hbm [shape: f32[128,384], index: 4, kind: input, shape index: {}]   ;;  %s2579_s5 = inlined_call_operand.hbm [shape: f32[256,384], index: 5, kind: output, shape index: {}]  }
   0x1   :  { %2612 = sst [smem:[#allocation44_spill]] %s2574_s0 }
   0x2   :  { %2613 = sst [smem:[#allocation45_spill]] %s2575_s1 }
   0x3   :  { %2614 = sst [smem:[#allocation46_spill]] %s2576_s2 }
   0x4   :  { %2615 = sst [smem:[#allocation47_spill]] %s2577_s3 }
   0x5   :  { %2616 = sst [smem:[#allocation48_spill]] %s2578_s4 }
   0x6   :  { %2617 = sst [smem:[#allocation49_spill]] %s2579_s5 }
   0x7   :  { %10 = vsyncpa [#allocation5], 0 }
   0x8   :  { %12 = vsyncpa [#allocation5 + $0x1], 0 }
   0x9   :  { %13 = vsyncpa [#allocation8], 0 }
   0xa   :  { %15 = vsyncpa [#allocation8 + $0x1], 0 }
   0xb   :  { %16 = vsyncpa [#allocation11], 0 }
   0xc   :  { %18 = vsyncpa [#allocation11 + $0x1], 0 }
   0xd   :  { %19 = vsyncpa [#allocation6], 0 }
   0xe   :  { %21 = vsyncpa [#allocation6 + $0x1], 0  ;;  %s1963_s18 = smov 0   ;;  %s1965_s19 = smov 0  }
   0xf   :  { %s1967_s20 = smov 0   ;;  %s1969_s21 = smov 0  }
  0x10   :  { %s1971_s22 = smov 0   ;;  %s1973_s23 = smov 0  }
  0x11   :  { %s1975_s24 = smov 0   ;;  %s1977_s25 = smov 0  }
  0x12   :  { %s1979_s26 = smov 0   ;;  %s1981_s27 = smov 0  }
  0x13   :  { %s1983_s28 = smov 0   ;;  %s1985_s29 = smov 0  }
  0x14   :  { %s1987_s30 = smov 0   ;;  %s1989_s6 = smov 0  }
  0x15   :  { %s1991_s7 = smov 0   ;;  %s1993_s8 = smov 0  }
  0x16   :  { %s1995_s9 = smov 0   ;;  %s1997_s10 = smov 0  }
  0x17   :  { %s1999_s11 = smov 0   ;;  %s2001_s12 = smov 0  }
  0x18   :  { %s2003_s13 = smov 0   ;;  %s2005_s14 = smov 0  }
  0x19 LB: > { %2618 = sst [smem:[#allocation20_spill]] %s1847_s20  ;;  %s2072_s15 = sadd.s32 4294967295, %s1923_s14   ;;  %s1923_s14 = sphi %s2005_s14, %s27_s14   ;;  %s1919_s13 = sphi %s2003_s13, %s2706_s13   ;;  %s1915_s12 = sphi %s2001_s12, %s2704_s12   ;;  %s1911_s11 = sphi %s1999_s11, %s2703_s11   ;;  %s1907_s10 = sphi %s1997_s10, %s2702_s10   ;;  %s1903_s9 = sphi %s1995_s9, %s2700_s9   ;;  %s1899_s8 = sphi %s1993_s8, %s2698_s8   ;;  %s1895_s7 = sphi %s1991_s7, %s2711_s7   ;;  %s1891_s6 = sphi %s1989_s6, %s2710_s6   ;;  %s1887_s30 = sphi %s1987_s30, %s2709_s30   ;;  %s1883_s29 = sphi %s1985_s29, %s2696_s29   ;;  %s1879_s28 = sphi %s1983_s28, %s2695_s28   ;;  %s1875_s27 = sphi %s1981_s27, %s2694_s27   ;;  %s1871_s26 = sphi %s1979_s26, %s2708_s26   ;;  %s1867_s25 = sphi %s1977_s25, %s2707_s25   ;;  %s1863_s24 = sphi %s1975_s24, %s2693_s24   ;;  %s1859_s23 = sphi %s1973_s23, %s2692_s23   ;;  %s1855_s22 = sphi %s1971_s22, %s2705_s22   ;;  %s1851_s21 = sphi %s1969_s21, %s2690_s21   ;;  %s1847_s20 = sphi %s1967_s20, %s2689_s20   ;;  %s1843_s19 = sphi %s1965_s19, %s2701_s19   ;;  %s1839_s18 = sphi %s1963_s18, %s2699_s18  }
  0x1a   : > { %2619 = sst [smem:[#allocation21_spill]] %s1855_s22  ;;  %p2604_p0 = scmp.eq.s32.totalorder %s1923_s14, 0 }
  0x1b   : > { %2620 = sst [smem:[#allocation22_spill]] %s1859_s23  ;;  %p69_p1 = scmp.eq.s32.totalorder %s2072_s15, 0 }
  0x1c   : > { %2621 = sst [smem:[#allocation23_spill]] %s1863_s24  ;;  %p90_p2 = scmp.ne.s32.totalorder %s1883_s29, %s1879_s28 }
  0x1d   : > { %2622 = sst [smem:[#allocation24_spill]] %s1867_s25  ;;  %p96_p3 = scmp.ne.s32.totalorder %s1879_s28, %s1875_s27 }
  0x1e   : > { %2623 = sst [smem:[#allocation25_spill]] %s1879_s28  ;;  %p204_p4 = scmp.eq.s32.totalorder %s2072_s15, 11 }
  0x1f   : > { %2624 = sst [smem:[#allocation26_spill]] %s1883_s29  ;;  %p92_p5 = por %p90_p2, %p2604_p0 }
  0x20   : > { %2625 = sst [smem:[#allocation27_spill]] %s1899_s8  ;;  %p2085_p6 = por %p96_p3, %p69_p1 }
  0x21   : > { %2626 = sst [smem:[#allocation28_spill]] %s1903_s9  ;;  %p2603_p7 = scmp.lt.s32.totalorder %s1923_s14, 12 }
  0x22   : > { %2627 = sst [smem:[#allocation29_spill]] %s1907_s10  ;;  %s256_s10 = sand.u32 1, %s1883_s29  }
  0x23   : > { %2628 = sst [smem:[#allocation30_spill]] %s1911_s11  ;;  %s1156_s9 = sshll.u32 %s256_s10, 7 }
  0x24   : > { %2629 = sst [smem:[#allocation31_spill]] %s1915_s12  ;;  %s1326_s8 = smul.u32 48, %s1911_s11 }
  0x25   : > { %2630 = sst [smem:[#allocation32_spill]] %s1919_s13  ;;  %p2095_p8 = pnand %p2603_p7, %p92_p5 }
  0x26   : > { %s2631_s17 = scalar_select %p2085_p6, 1, 0 }
  0x27   : > { %s263_s27 = sadd.s32 %s1915_s12, %s1326_s8  ;;  %s258_s28 = scalar_lea.vmem [#allocation7], %s1156_s9 }
  0x28   : > { %2632 = sst [smem:[#allocation33_spill]] %s2631_s17  ;;  %s268_s4 = sshll.u32 %s258_s28, 4  ;;  %s269_s4 = int_to_ptr.vmem [resolvable:$true] %s268_s4 }
  0x29   : > { %s1159_s2 = sshll.u32 %s263_s27, 3  ;;  %s2634_s1 = sld [smem:[#allocation45_spill]] }
  0x2a   : > { %p1165_p9 = scmp.ge.s32.totalorder %s1923_s14, 1  ;;  %s2635_s24 = sand.u32 1, %s1923_s14  }
  0x2b   : > { %s2106_s8 = scalar_lea.sflag [#allocation8], %s2635_s24  ;;  %s2588_s28 = smov 384  }
  0x2c   : > { %2636 = sst [smem:[#allocation34_spill]] %s2106_s8  ;;  %s2589_s9 = smov 128  }
  0x2d   : > { %s2591_s27 = smov 8   ;;  %p338_p10 = scmp.lt.s32.totalorder %s1923_s14, 13 }
  0x2e   : > { %s39_s5 = sadd.s32 1, %s1911_s11  ;;  %s42_s24 = sadd.s32 1, %s1915_s12 }
  0x2f   : > { %s265_s10 = scalar_lea.hbm %s2634_s1, %s1159_s2  ;;  %p2115_p11 = pnand %p1165_p9, %p338_p10 }
  0x30   : > { %s266_s0 = sshll.u32 %s265_s10, 4  ;;  %p40_p12 = scmp.ge.s32.totalorder %s39_s5, 2  ;;  %s267_s0 = int_to_ptr.hbm [resolvable:$true] %s266_s0 }
  0x31   : > { %1346 = dma.hbm_to_vmem [thread:$0]  (!%p2095_p8), %s267_s0, 2048, %s269_s4, %s2106_s8, %s2588_s28, %s2589_s9, %s2591_s27  }
  0x32   : > { %s2637_s2 = scalar_select %p2115_p11, 1, 0 }
  0x33   : > { %p132_p13 = scmp.eq.s32.totalorder %s1915_s12, 0  ;;  %s139_s17 = sadd.s32 1, %s1859_s23 }
  0x34   : > { %2638 = sst [smem:[#allocation35_spill]] %s2637_s2  ;;  %p146_p2 = scmp.ne.s32.totalorder %s1859_s23, %s1855_s22 }
  0x35   : > { %s2713_s5 = smov (%p40_p12, %s39_s5), 0  ;;  %s2715_s24 = smov (!%p40_p12, %s42_s24), %s1915_s12 }
  0x36   : > { %2639 = sst [smem:[#allocation36_spill]] %s2713_s5  ;;  %s2132_s0 = ssub.s32 %s1911_s11, %s2713_s5 }
  0x37   : > { %p2136_p3 = por %p146_p2, %p2604_p0  ;;  %p44_p5 = scmp.ge.s32.totalorder %s2715_s24, 3 }
  0x38   : > { %p152_p8 = scmp.ne.s32.totalorder %s1855_s22, %s1851_s21  ;;  %s297_s21 = sand.u32 1, %s1859_s23  }
  0x39   : > { %s133_s16 = scalar_select %p132_p13, %s1911_s11, 0 }
  0x3a   : > { %s2147_s10 = scalar_select %p44_p5, 0, %s2715_s24  }
  0x3b   : > { %p2151_p9 = por %p152_p8, %p69_p1  ;;  %s1160_s1 = sshll.u32 %s297_s21, 7 }
  0x3c   : > { %2641 = sst [smem:[#allocation37_spill]] %s2147_s10  ;;  %s2157_s9 = ssub.s32 %s1915_s12, %s2147_s10 }
  0x3d   : > { %s2642_s28 = scalar_select %p2151_p9, 1, 0 }
  0x3e   : > { %p134_p10 = scmp.eq.s32.totalorder %s2147_s10, 0  ;;  %s80_s27 = sor.u32 %s2157_s9, %s2132_s0 }
  0x3f   : > { %2643 = sst [smem:[#allocation38_spill]] %s2642_s28  ;;  %p81_p12 = scmp.eq.s32.totalorder %s80_s27, 0 }
  0x40   : > { %s135_s22 = scalar_select %p134_p10, %s2713_s5, 0 }
  0x41   : > { %s2644_s2 = sadd.s32 1, %s1883_s29  ;;  %s1181_s10 = sshll.u32 %s133_s16, 7 }
  0x42   : > { %s2167_s8 = scalar_select %p81_p12, %s1883_s29, %s2644_s2  }
  0x43   : > { %s136_s25 = ssub.s32 %s133_s16, %s135_s22  ;;  %s2646_s3 = sld [smem:[#allocation47_spill]] }
  0x44   : > { %2645 = sst [smem:[#allocation39_spill]] %s2167_s8  ;;  %p137_p13 = scmp.eq.s32.totalorder %s136_s25, 0 }
  0x45   : > { %s299_s21 = scalar_lea.vmem [#allocation10], %s1160_s1  ;;  %p1350_p2 = pnand %p2603_p7, %p2136_p3 }
  0x46   : > { %s309_s5 = sshll.u32 %s299_s21, 4  ;;  %s2648_s25 = sand.u32 1, %s1923_s14   ;;  %s310_s5 = int_to_ptr.vmem [resolvable:$true] %s309_s5 }
  0x47   : > { %s2173_s2 = scalar_select %p137_p13, %s1859_s23, %s139_s17  }
  0x48   : > { %s2181_s12 = scalar_lea.sflag [#allocation11], %s2648_s25  ;;  %s2649_s1 = smov 8  }
  0x49   : > { %s306_s27 = scalar_lea.hbm %s2646_s3, %s1181_s10  ;;  %2647 = sst [smem:[#allocation40_spill]] %s2173_s2 }
  0x4a   : > { %s307_s22 = sshll.u32 %s306_s27, 4  ;;  %s2650_s28 = smov 128   ;;  %s308_s22 = int_to_ptr.hbm [resolvable:$true] %s307_s22 }
  0x4b   : > { %1352 = dma.hbm_to_vmem [thread:$0]  (!%p1350_p2), %s308_s22, 2048, %s310_s5, %s2181_s12, %s2650_s28, %s2650_s28, %s2649_s1  }
  0x4c   : > { %s1149_s17 = sadd.s32 4294967294, %s1923_s14   ;;  %s46_s16 = sadd.s32 1, %s1919_s13 }
  0x4d   : > { %s55_s10 = sadd.s32 1, %s1895_s7  ;;  %s2717_s16 = smov (!%p44_p5, %s46_s16), %s1919_s13 }
  0x4e   : > { %p62_p8 = scmp.ne.s32.totalorder %s1895_s7, %s1891_s6  ;;  %p68_p10 = scmp.ne.s32.totalorder %s1891_s6, %s1887_s30 }
  0x4f   : > { %p48_p3 = scmp.ge.s32.totalorder %s2717_s16, 2  ;;  %s193_s4 = sadd.s32 1, %s1847_s20 }
  0x50   : > { %p2200_p12 = por %p2604_p0, %p62_p8  ;;  %p2206_p13 = por %p69_p1, %p68_p10 }
  0x51   : > { %s2719_s16 = smov (%p48_p3, %s2717_s16), 0  ;;  %p203_p5 = scmp.ne.s32.totalorder %s1847_s20, %s1843_s19 }
  0x52   : > { %2653 = sst [smem:[#allocation41_spill]] %s2719_s16  ;;  %p209_p2 = scmp.ne.s32.totalorder %s1843_s19, %s1839_s18 }
  0x53   : > { %s50_s30 = ssub.s32 %s1919_s13, %s2719_s16  ;;  %p210_p7 = scmp.eq.s32.totalorder %s1149_s17, 11 }
  0x54   : > { %s52_s24 = sor.u32 %s2132_s0, %s50_s30  ;;  %s190_s21 = sor.u32 %s2157_s9, %s50_s30 }
  0x55   : > { %p53_p8 = scmp.eq.s32.totalorder %s52_s24, 0  ;;  %p191_p0 = scmp.eq.s32.totalorder %s190_s21, 0 }
  0x56   : > { %p2222_p9 = por %p204_p4, %p203_p5  ;;  %p2226_p10 = por %p210_p7, %p209_p2 }
  0x57   : > { %s2231_s3 = scalar_select %p53_p8, %s1895_s7, %s55_s10  }
  0x58   : > { %s2234_s8 = scalar_select %p191_p0, %s1847_s20, %s193_s4  }
  0x59   : > { %2656 = sst [smem:[#allocation42_spill]] %s2231_s3  ;;  %s230_s0 = sand.u32 1, %s1895_s7  }
  0x5a   : > { %2657 = sst [smem:[#allocation43_spill]] %s2234_s8  ;;  %s1180_s17 = sshll.u32 %s1919_s13, 5 }
  0x5b   : > { %s2658_s30 = sld [smem:[#allocation24_spill]]  ;;  %s1152_s24 = sshll.u32 %s230_s0, 7 }
  0x5c   : > { %s239_s21 = sadd.s32 %s1911_s11, %s1180_s17  ;;  %s2659_s29 = sld [smem:[#allocation23_spill]] }
  0x5d   : > { %s1155_s16 = sshll.u32 %s239_s21, 3  ;;  %s234_s2 = scalar_lea.vmem [#allocation4], %s1152_s24 }
  0x5e   : > { %s244_s23 = sshll.u32 %s234_s2, 4  ;;  %s2660_s4 = sld [smem:[#allocation44_spill]]  ;;  %s245_s23 = int_to_ptr.vmem [resolvable:$true] %s244_s23 }
  0x5f   : > { %s2661_s8 = sld [smem:[#allocation31_spill]]  ;;  %p2662_p0 = scmp.lt.s32.totalorder %s1923_s14, 12 }
  0x60   : > { %s231_s17 = scalar_lea.sflag [#allocation5], %s230_s0  ;;  %s1928_s11 = smov 256  }
  0x61   : > { %p1341_p4 = pnand %p2662_p0, %p2200_p12  ;;  %p107_p7 = scmp.eq.s32.totalorder %s2157_s9, 0 }
  0x62   : > { %s109_s2 = sadd.s32 1, %s1871_s26  ;;  %p116_p3 = scmp.ne.s32.totalorder %s1871_s26, %s2658_s30 }
  0x63   : > { %s2253_s3 = scalar_select %p107_p7, %s1871_s26, %s109_s2  }
  0x64   : > { %s241_s20 = scalar_lea.hbm %s2660_s4, %s1155_s16  ;;  %p2663_p5 = scmp.eq.s32.totalorder %s1923_s14, 0 }
  0x65   : > { %s242_s13 = sshll.u32 %s241_s20, 4  ;;  %s2664_s16 = sld [smem:[#allocation34_spill]]  ;;  %s243_s13 = int_to_ptr.hbm [resolvable:$true] %s242_s13 }
  0x66   : > { %1343 = dma.hbm_to_vmem [thread:$0]  (!%p1341_p4), %s243_s13, 2048, %s245_s23, %s231_s17, %s1928_s11, %s2650_s28, %s2649_s1  }
  0x67   : > { %p118_p2 = por %p116_p3, %p2663_p5  ;;  %p122_p8 = scmp.ne.s32.totalorder %s2658_s30, %s2659_s29 }
  0x68   : > { %s280_s20 = sand.u32 1, %s1871_s26   ;;  %s2665_s21 = sld [smem:[#allocation46_spill]] }
  0x69   : > { %p2266_p12 = por %p122_p8, %p69_p1  ;;  %s281_s11 = scalar_lea.vmem [#allocation9], %s280_s20 }
  0x6a   : > { %s288_s13 = sshll.u32 %s281_s11, 4  ;;  %p1347_p4 = pnand %p2662_p0, %p118_p2  ;;  %s289_s13 = int_to_ptr.vmem [resolvable:$true] %s288_s13 }
  0x6b   : > { %s1163_s9 = sshll.u32 %s280_s20, 7  ;;  %s1164_s29 = sshll.u32 %s2661_s8, 3 }
  0x6c   : > { %s323_s30 = scalar_lea.vmem [#allocation12], %s1163_s9  ;;  %s2667_s27 = sld [smem:[#allocation48_spill]] }
  0x6d   : > { %s330_s4 = sshll.u32 %s323_s30, 4  ;;  %s331_s4 = int_to_ptr.vmem [resolvable:$true] %s330_s4 }
  0x6e   : > { %s284_s0 = scalar_lea.hbm %s2665_s21, %s2661_s8  ;;  %s344_s8 = sand.u32 (!%p2115_p11), 1, %s1891_s6  }
  0x6f   : > { %s286_s23 = sshll.u32 %s284_s0, 4  ;;  %s2668_s0 = smov 384   ;;  %s287_s23 = int_to_ptr.hbm [resolvable:$true] %s286_s23 }
  0x70   : > { %1349 = dma.hbm_to_vmem [thread:$0]  (!%p1347_p4), %s287_s23, 16, %s289_s13, %s2664_s16  }
  0x71   : > { %342 = sbr.rel (%p2115_p11) target bundleno = 859 (0x35b), region = 40  ;;  %s1166_s20 = sshll.u32 (!%p2115_p11), %s344_s8, 7 }
  0x72   : > { %s327_s24 = scalar_lea.hbm %s2667_s27, %s1164_s29  ;;  %s345_s9 = scalar_lea.sflag (!%p2115_p11), [#allocation5], %s344_s8 }
  0x73   : > { %s328_s21 = sshll.u32 %s327_s24, 4  ;;  %s2284_s16 = scalar_lea.vmem (!%p2115_p11), [#allocation4], %s1166_s20  ;;  %s329_s21 = int_to_ptr.hbm [resolvable:$true] %s328_s21 }
  0x74   : > { %1355 = dma.hbm_to_vmem [thread:$0]  (!%p1347_p4), %s329_s21, 2048, %s331_s4, %s2181_s12, %s2668_s0, %s2650_s28, %s2649_s1  }
  0x76   : > { %1814 = dma.done.wait (%p2206_p13), %s345_s9, 2048  }
  0x77   : > { %1816 = vsyncadd (%p2206_p13), %s345_s9, 4294965248  ;;  %s2670_s23 = sld [smem:[#allocation25_spill]]  ;;  %s354_s29 = sand.u32 1, %s2072_s15  }
  0x78   : > { %s355_s28 = scalar_lea.sflag [#allocation8], %s354_s29 }
  0x7d   : > { %s356_s12 = sand.u32 1, %s2670_s23  }
  0x7e   : > { %s1167_s1 = sshll.u32 %s356_s12, 7 }
  0x7f   : > { %s2292_s30 = scalar_lea.vmem [#allocation7], %s1167_s1 }
  0x80   : > { %1818 = dma.done.wait (%p2085_p6), %s355_s28, 2048  }
  0x81   : > { %1820 = vsyncadd (%p2085_p6), %s355_s28, 4294965248  ;;  %s2672_s4 = sld [smem:[#allocation24_spill]] }
  0x87   : > { %s366_s17 = sand.u32 1, %s2672_s4  }
  0x88   : > { %s367_s2 = scalar_lea.vmem [#allocation9], %s366_s17 }
  0x89   : > { %1822 = dma.done.wait (%p2266_p12), %s355_s28, 16  }
  0x8a   : > { %1824 = vsyncadd (%p2266_p12), %s355_s28, 4294967280  ;;  %s2673_s15 = sld [smem:[#allocation21_spill]]  ;;  %s374_s21 = scalar_lea.sflag [#allocation11], %s354_s29 }
  0x8b   : > { %s2674_s5 = sld [smem:[#allocation38_spill]] }
  0x90   : > { %s375_s27 = sand.u32 1, %s2673_s15  }
  0x91   : > { %s1168_s24 = sshll.u32 %s375_s27, 7  ;;  %p2675_p1 = scmp.ne.s32.totalorder %s2674_s5, 0 }
  0x92   : > { %s2304_s0 = scalar_lea.vmem [#allocation10], %s1168_s24 }
  0x93   : > { %1826 = dma.done.wait (%p2675_p1), %s374_s21, 2048  }
  0x94   : > { %1828 = vsyncadd (%p2675_p1), %s374_s21, 4294965248  ;;  %s1169_s11 = sshll.u32 %s366_s17, 7 }
  0x95   : > { %s2310_s8 = scalar_lea.vmem [#allocation12], %s1169_s11 }
  0x96   : > { %1830 = dma.done.wait (%p2266_p12), %s374_s21, 2048  }
  0x97   : > { %1832 = vsyncadd (%p2266_p12), %s374_s21, 4294965248  ;;  %s2676_s20 = sld [smem:[#allocation27_spill]]  ;;  %s431_s9 = sand.u32 1, %s1843_s19  }
  0x98   : > { %s1170_s23 = sshll.u32 %s431_s9, 7 }
  0x99   : > { %s2320_s13 = scalar_lea.vmem [#allocation13], %s1170_s23 }
  0x9d   : > { %p440_p6 = scmp.eq.s32.totalorder %s2676_s20, 0  ;;  %p1171_p11 = scmp.ne.s32.totalorder %s2676_s20, 0 }
  0x9f   : > { %443 = sbr.rel (%p1171_p11) target bundleno = 181 (0xb5), region = 64 }
  0xa4   : > { %v1546_v0 = vld [vmem:[%s367_s2] ss:$0 sm:$0xff] }
  0xa5   : > { %448 = vst [vmem:[#allocation2 + $0x30] sm:$0xff] %v1546_v0 }
  0xa6   : > { %449 = vst [vmem:[#allocation2] sm:$0xff] %v1546_v0 }
  0xa7   : > { %450 = vst [vmem:[#allocation2 + $0x58] sm:$0xff] %v1546_v0 }
  0xa8   : > { %451 = vst [vmem:[#allocation2 + $0x18] sm:$0xff] %v1546_v0 }
  0xa9   : > { %452 = vst [vmem:[#allocation2 + $0x50] sm:$0xff] %v1546_v0 }
  0xaa   : > { %453 = vst [vmem:[#allocation2 + $0x68] sm:$0xff] %v1546_v0 }
  0xab   : > { %454 = vst [vmem:[#allocation2 + $0x8] sm:$0xff] %v1546_v0 }
  0xac   : > { %455 = vst [vmem:[#allocation2 + $0x48] sm:$0xff] %v1546_v0 }
  0xad   : > { %456 = vst [vmem:[#allocation2 + $0x40] sm:$0xff] %v1546_v0 }
  0xae   : > { %457 = vst [vmem:[#allocation2 + $0x20] sm:$0xff] %v1546_v0 }
  0xaf   : > { %458 = vst [vmem:[#allocation2 + $0x10] sm:$0xff] %v1546_v0 }
  0xb0   : > { %459 = vst [vmem:[#allocation2 + $0x38] sm:$0xff] %v1546_v0 }
  0xb1   : > { %460 = vst [vmem:[#allocation2 + $0x60] sm:$0xff] %v1546_v0 }
  0xb2   : > { %461 = vst [vmem:[#allocation2 + $0x70] sm:$0xff] %v1546_v0 }
  0xb3   : > { %462 = vst [vmem:[#allocation2 + $0x78] sm:$0xff] %v1546_v0 }
  0xb4   : > { %463 = vst [vmem:[#allocation2 + $0x28] sm:$0xff] %v1546_v0 }
  0xb5 PF: > { %s2677_s10 = sld [smem:[#allocation28_spill]] }
  0xbb   : > { %p464_p13 = scmp.eq.s32.totalorder %s2677_s10, 0 }
  0xbd   : > { %p465_p7 = pnand %p464_p13, %p440_p6 }
  0xbf   : > { %468 = sbr.rel (%p465_p7) target bundleno = 213 (0xd5), region = 68 }
  0xc4   : > { %v1929_v1 = vmov 0.0  }
  0xc5   : > { %469 = vst [vmem:[#allocation3 + $0x28] sm:$0xff] %v1929_v1 }
  0xc6   : > { %470 = vst [vmem:[#allocation3 + $0x68] sm:$0xff] %v1929_v1 }
  0xc7   : > { %471 = vst [vmem:[#allocation3 + $0x10] sm:$0xff] %v1929_v1 }
  0xc8   : > { %472 = vst [vmem:[#allocation3 + $0x40] sm:$0xff] %v1929_v1 }
  0xc9   : > { %473 = vst [vmem:[#allocation3 + $0x48] sm:$0xff] %v1929_v1 }
  0xca   : > { %474 = vst [vmem:[#allocation3 + $0x30] sm:$0xff] %v1929_v1 }
  0xcb   : > { %475 = vst [vmem:[#allocation3 + $0x70] sm:$0xff] %v1929_v1 }
  0xcc   : > { %476 = vst [vmem:[#allocation3 + $0x38] sm:$0xff] %v1929_v1 }
  0xcd   : > { %477 = vst [vmem:[#allocation3 + $0x20] sm:$0xff] %v1929_v1 }
  0xce   : > { %478 = vst [vmem:[#allocation3 + $0x78] sm:$0xff] %v1929_v1 }
  0xcf   : > { %479 = vst [vmem:[#allocation3 + $0x18] sm:$0xff] %v1929_v1 }
  0xd0   : > { %480 = vst [vmem:[#allocation3 + $0x58] sm:$0xff] %v1929_v1 }
  0xd1   : > { %481 = vst [vmem:[#allocation3] sm:$0xff] %v1929_v1 }
  0xd2   : > { %482 = vst [vmem:[#allocation3 + $0x8] sm:$0xff] %v1929_v1 }
  0xd3   : > { %483 = vst [vmem:[#allocation3 + $0x60] sm:$0xff] %v1929_v1 }
  0xd4   : > { %484 = vst [vmem:[#allocation3 + $0x50] sm:$0xff] %v1929_v1 }
  0xd5 PF: > { %v532_v2 = vld [vmem:[%s2292_s30 + $0x78] sm:$0xff]  ;;  %v531_v3 = vld [vmem:[%s2292_s30 + $0x70] sm:$0xff]  ;;  %v530_v4 = vld [vmem:[%s2292_s30 + $0x68] sm:$0xff] }
  0xd6   : > { %1183 = vmatpush.msra.mxu2 %v532_v2  ;;  %1184 = vmatpush.msra.mxu3 %v532_v2  ;;  %v529_v5 = vld [vmem:[%s2292_s30 + $0x60] sm:$0xff]  ;;  %v528_v6 = vld [vmem:[%s2292_s30 + $0x58] sm:$0xff]  ;;  %v527_v7 = vld [vmem:[%s2292_s30 + $0x50] sm:$0xff] }
  0xd7   : > { %533 = vmatpush.msra.mxu0 %v532_v2  ;;  %1182 = vmatpush.msra.mxu1 %v532_v2  ;;  %v526_v8 = vld [vmem:[%s2292_s30 + $0x48] sm:$0xff]  ;;  %v525_v9 = vld [vmem:[%s2292_s30 + $0x40] sm:$0xff]  ;;  %v524_v10 = vld [vmem:[%s2292_s30 + $0x38] sm:$0xff] }
  0xd8   : > { %1186 = vmatpush.msra.mxu2 %v531_v3  ;;  %1187 = vmatpush.msra.mxu3 %v531_v3  ;;  %v523_v11 = vld [vmem:[%s2292_s30 + $0x30] sm:$0xff]  ;;  %v522_v12 = vld [vmem:[%s2292_s30 + $0x28] sm:$0xff]  ;;  %v521_v13 = vld [vmem:[%s2292_s30 + $0x20] sm:$0xff] }
  0xd9   : > { %534 = vmatpush.msra.mxu0 %v531_v3  ;;  %1185 = vmatpush.msra.mxu1 %v531_v3  ;;  %v520_v14 = vld [vmem:[%s2292_s30 + $0x18] sm:$0xff]  ;;  %v519_v15 = vld [vmem:[%s2292_s30 + $0x10] sm:$0xff]  ;;  %v518_v16 = vld [vmem:[%s2292_s30 + $0x8] sm:$0xff] }
  0xda   : > { %1189 = vmatpush.msra.mxu2 %v530_v4  ;;  %1190 = vmatpush.msra.mxu3 %v530_v4  ;;  %v517_v17 = vld [vmem:[%s2292_s30] sm:$0xff]  ;;  %v2361_v22 = vld [vmem:[%s2284_s16 + $0x48] sm:$0xff]  ;;  %v2377_v26 = vld [vmem:[%s2284_s16 + $0x50] sm:$0xff] }
  0xdb   : > { %535 = vmatpush.msra.mxu0 %v530_v4  ;;  %1188 = vmatpush.msra.mxu1 %v530_v4  ;;  %v2345_v18 = vld [vmem:[%s2284_s16 + $0x40] sm:$0xff]  ;;  %v2364_v23 = vld [vmem:[%s2284_s16 + $0x68] sm:$0xff]  ;;  %v2380_v27 = vld [vmem:[%s2284_s16 + $0x70] sm:$0xff] }
  0xdc   : > { %1192 = vmatpush.msra.mxu2 %v529_v5  ;;  %1193 = vmatpush.msra.mxu3 %v529_v5  ;;  %v2348_v19 = vld [vmem:[%s2284_s16 + $0x60] sm:$0xff]  ;;  %v2367_v24 = vld [vmem:[%s2284_s16 + $0x8] sm:$0xff]  ;;  %v2383_v28 = vld [vmem:[%s2284_s16 + $0x10] sm:$0xff] }
  0xdd   : > { %536 = vmatpush.msra.mxu0 %v529_v5  ;;  %1191 = vmatpush.msra.mxu1 %v529_v5  ;;  %v2351_v20 = vld [vmem:[%s2284_s16] sm:$0xff]  ;;  %v2370_v25 = vld [vmem:[%s2284_s16 + $0x28] sm:$0xff]  ;;  %v2386_v29 = vld [vmem:[%s2284_s16 + $0x30] sm:$0xff] }
  0xde   : > { %1195 = vmatpush.msra.mxu2 %v528_v6  ;;  %1196 = vmatpush.msra.mxu3 %v528_v6  ;;  %v2354_v21 = vld [vmem:[%s2284_s16 + $0x20] sm:$0xff]  ;;  %v2393_v30 = vld [vmem:[%s2284_s16 + $0x58] sm:$0xff]  ;;  %v501_v34 = vld [vmem:[#allocation2 + $0x30] sm:$0xff] }
  0xdf   : > { %537 = vmatpush.msra.mxu0 %v528_v6  ;;  %1194 = vmatpush.msra.mxu1 %v528_v6  ;;  %v2396_v31 = vld [vmem:[%s2284_s16 + $0x78] sm:$0xff]  ;;  %v505_v35 = vld [vmem:[#allocation2 + $0x50] sm:$0xff]  ;;  %v509_v40 = vld [vmem:[#allocation2 + $0x40] sm:$0xff] }
  0xe0   : > { %1198 = vmatpush.msra.mxu2 %v527_v7  ;;  %1199 = vmatpush.msra.mxu3 %v527_v7  ;;  %v2399_v32 = vld [vmem:[%s2284_s16 + $0x18] sm:$0xff]  ;;  %v513_v41 = vld [vmem:[#allocation2 + $0x60] sm:$0xff]  ;;  %v506_v47 = vld [vmem:[#allocation2 + $0x68] sm:$0xff] }
  0xe1   : > { %538 = vmatpush.msra.mxu0 %v527_v7  ;;  %1197 = vmatpush.msra.mxu1 %v527_v7  ;;  %v2402_v33 = vld [vmem:[%s2284_s16 + $0x38] sm:$0xff]  ;;  %v502_v46 = vld [vmem:[#allocation2] sm:$0xff]  ;;  %v514_v53 = vld [vmem:[#allocation2 + $0x70] sm:$0xff]  ;;  %s2679_s16 = sld [smem:[#allocation28_spill]] }
  0xe2   : > { %1201 = vmatpush.msra.mxu2 %v526_v8  ;;  %1202 = vmatpush.msra.mxu3 %v526_v8  ;;  %v510_v52 = vld [vmem:[#allocation2 + $0x20] sm:$0xff]  ;;  %v503_v58 = vld [vmem:[#allocation2 + $0x58] sm:$0xff]  ;;  %v507_v59 = vld [vmem:[#allocation2 + $0x8] sm:$0xff] }
  0xe3   : > { %539 = vmatpush.msra.mxu0 %v526_v8  ;;  %1200 = vmatpush.msra.mxu1 %v526_v8  ;;  %v511_v0 = vld [vmem:[#allocation2 + $0x10] sm:$0xff]  ;;  %v515_v1 = vld [vmem:[#allocation2 + $0x78] sm:$0xff]  ;;  %v508_v7 = vld [vmem:[#allocation2 + $0x48] sm:$0xff] }
  0xe4   : > { %1204 = vmatpush.msra.mxu2 %v525_v9  ;;  %1205 = vmatpush.msra.mxu3 %v525_v9  ;;  %v504_v6 = vld [vmem:[#allocation2 + $0x18] sm:$0xff] }
  0xe5   : > { %540 = vmatpush.msra.mxu0 %v525_v9  ;;  %1203 = vmatpush.msra.mxu1 %v525_v9 }
  0xe6   : > { %1207 = vmatpush.msra.mxu2 %v524_v10  ;;  %1208 = vmatpush.msra.mxu3 %v524_v10 }
  0xe7   : > { %541 = vmatpush.msra.mxu0 %v524_v10  ;;  %1206 = vmatpush.msra.mxu1 %v524_v10  ;;  %p1172_p3 = scmp.ne.s32.totalorder %s2679_s16, 0 }
  0xe8   : > { %1210 = vmatpush.msra.mxu2 %v523_v11  ;;  %1211 = vmatpush.msra.mxu3 %v523_v11 }
  0xe9   : > { %542 = vmatpush.msra.mxu0 %v523_v11  ;;  %1209 = vmatpush.msra.mxu1 %v523_v11 }
  0xea   : > { %1213 = vmatpush.msra.mxu2 %v522_v12  ;;  %1214 = vmatpush.msra.mxu3 %v522_v12 }
  0xeb   : > { %543 = vmatpush.msra.mxu0 %v522_v12  ;;  %1212 = vmatpush.msra.mxu1 %v522_v12  ;;  %v512_v12 = vld [vmem:[#allocation2 + $0x38] sm:$0xff] }
  0xec   : > { %1216 = vmatpush.msra.mxu2 %v521_v13  ;;  %1217 = vmatpush.msra.mxu3 %v521_v13 }
  0xed   : > { %544 = vmatpush.msra.mxu0 %v521_v13  ;;  %1215 = vmatpush.msra.mxu1 %v521_v13  ;;  %v516_v13 = vld [vmem:[#allocation2 + $0x28] sm:$0xff] }
  0xee   : > { %1219 = vmatpush.msra.mxu2 %v520_v14  ;;  %1220 = vmatpush.msra.mxu3 %v520_v14 }
  0xef   : > { %545 = vmatpush.msra.mxu0 %v520_v14  ;;  %1218 = vmatpush.msra.mxu1 %v520_v14 }
  0xf0   : > { %1222 = vmatpush.msra.mxu2 %v519_v15  ;;  %1223 = vmatpush.msra.mxu3 %v519_v15 }
  0xf1   : > { %546 = vmatpush.msra.mxu0 %v519_v15  ;;  %1221 = vmatpush.msra.mxu1 %v519_v15 }
  0xf2   : > { %1225 = vmatpush.msra.mxu2 %v518_v16  ;;  %1226 = vmatpush.msra.mxu3 %v518_v16 }
  0xf3   : > { %547 = vmatpush.msra.mxu0 %v518_v16  ;;  %1224 = vmatpush.msra.mxu1 %v518_v16 }
  0xf4   : > { %1228 = vmatpush.msra.mxu2 %v517_v17  ;;  %1229 = vmatpush.msra.mxu3 %v517_v17 }
  0xf5   : > { %573 = vmatmul.f32.vlgmr.msra.gmra.mxu2 %v2345_v18  ;;  %585 = vmatmul.f32.vlgmr.msra.gmra.mxu3 %v2348_v19 }
  0xf6   : > { %548 = vmatpush.msra.mxu0 %v517_v17  ;;  %1227 = vmatpush.msra.mxu1 %v517_v17 }
  0xf7   : > { %549 = vmatmul.f32.vlgmr.msra.gmra.mxu0 %v2351_v20  ;;  %561 = vmatmul.f32.vlgmr.msra.gmra.mxu1 %v2354_v21 }
  0xfd   : > { %576 = vmatmul.f32.gmra.mxu2 %v2361_v22  ;;  %588 = vmatmul.f32.gmra.mxu3 %v2364_v23 }
  0xff   : > { %552 = vmatmul.f32.gmra.mxu0 %v2367_v24  ;;  %564 = vmatmul.f32.gmra.mxu1 %v2370_v25 }
 0x105   : > { %579 = vmatmul.f32.gmra.mxu2 %v2377_v26  ;;  %591 = vmatmul.f32.gmra.mxu3 %v2380_v27 }
 0x107   : > { %555 = vmatmul.f32.gmra.mxu0 %v2383_v28  ;;  %567 = vmatmul.f32.gmra.mxu1 %v2386_v29 }
 0x10d   : > { %582 = vmatmul.f32.gmra.mxu2 %v2393_v30  ;;  %594 = vmatmul.f32.gmra.mxu3 %v2396_v31 }
 0x10f   : > { %558 = vmatmul.f32.gmra.mxu0 %v2399_v32  ;;  %570 = vmatmul.f32.gmra.mxu1 %v2402_v33 }
 0x174   : > { %v550_v36 = vpop.f32.mrf.mxu0  ;;  %v562_v37 = vpop.f32.mrf.mxu1 }
 0x175   : > { %v598_v38 = vadd.f32 %v550_v36, %v501_v34  ;;  %v602_v39 = vadd.f32 %v562_v37, %v505_v35 }
 0x177   : > { %614 = vst [vmem:[#allocation2 + $0x30] sm:$0xff] %v598_v38 }
 0x178   : > { %618 = vst [vmem:[#allocation2 + $0x50] sm:$0xff] %v602_v39  ;;  %v574_v42 = vpop.f32.mrf.mxu2  ;;  %v586_v43 = vpop.f32.mrf.mxu3 }
 0x179   : > { %v606_v44 = vadd.f32 %v574_v42, %v509_v40  ;;  %v610_v45 = vadd.f32 %v586_v43, %v513_v41 }
 0x17b   : > { %622 = vst [vmem:[#allocation2 + $0x40] sm:$0xff] %v606_v44 }
 0x17c   : > { %626 = vst [vmem:[#allocation2 + $0x60] sm:$0xff] %v610_v45  ;;  %v553_v48 = vpop.f32.mrf.mxu0  ;;  %v565_v49 = vpop.f32.mrf.mxu1 }
 0x17d   : > { %v599_v50 = vadd.f32 %v553_v48, %v502_v46  ;;  %v603_v51 = vadd.f32 %v565_v49, %v506_v47 }
 0x17f   : > { %615 = vst [vmem:[#allocation2] sm:$0xff] %v599_v50 }
 0x180   : > { %619 = vst [vmem:[#allocation2 + $0x68] sm:$0xff] %v603_v51  ;;  %v577_v54 = vpop.f32.mrf.mxu2  ;;  %v589_v55 = vpop.f32.mrf.mxu3 }
 0x181   : > { %v607_v56 = vadd.f32 %v577_v54, %v510_v52  ;;  %v611_v57 = vadd.f32 %v589_v55, %v514_v53 }
 0x183   : > { %623 = vst [vmem:[#allocation2 + $0x20] sm:$0xff] %v607_v56 }
 0x184   : > { %627 = vst [vmem:[#allocation2 + $0x70] sm:$0xff] %v611_v57  ;;  %v556_v60 = vpop.f32.mrf.mxu0  ;;  %v568_v61 = vpop.f32.mrf.mxu1 }
 0x185   : > { %v600_v62 = vadd.f32 %v556_v60, %v503_v58  ;;  %v604_v63 = vadd.f32 %v568_v61, %v507_v59 }
 0x187   : > { %616 = vst [vmem:[#allocation2 + $0x58] sm:$0xff] %v600_v62 }
 0x188   : > { %620 = vst [vmem:[#allocation2 + $0x8] sm:$0xff] %v604_v63  ;;  %v580_v2 = vpop.f32.mrf.mxu2  ;;  %v592_v3 = vpop.f32.mrf.mxu3 }
 0x189   : > { %v608_v4 = vadd.f32 %v580_v2, %v511_v0  ;;  %v612_v5 = vadd.f32 %v592_v3, %v515_v1 }
 0x18b   : > { %624 = vst [vmem:[#allocation2 + $0x10] sm:$0xff] %v608_v4 }
 0x18c   : > { %628 = vst [vmem:[#allocation2 + $0x78] sm:$0xff] %v612_v5  ;;  %v559_v8 = vpop.f32.mrf.mxu0  ;;  %v571_v9 = vpop.f32.mrf.mxu1 }
 0x18d   : > { %v601_v10 = vadd.f32 %v559_v8, %v504_v6  ;;  %v605_v11 = vadd.f32 %v571_v9, %v508_v7 }
 0x18f   : > { %617 = vst [vmem:[#allocation2 + $0x18] sm:$0xff] %v601_v10 }
 0x190   : > { %621 = vst [vmem:[#allocation2 + $0x48] sm:$0xff] %v605_v11  ;;  %v583_v14 = vpop.f32.mrf.mxu2  ;;  %v595_v15 = vpop.f32.mrf.mxu3  ;;  %632 = sbr.rel (%p1172_p3) target bundleno = 597 (0x255), region = 72 }
 0x191   : > { %v609_v16 = vadd.f32 %v583_v14, %v512_v12  ;;  %v613_v17 = vadd.f32 %v595_v15, %v516_v13 }
 0x193   : > { %625 = vst [vmem:[#allocation2 + $0x38] sm:$0xff] %v609_v16 }
 0x194   : > { %629 = vst [vmem:[#allocation2 + $0x28] sm:$0xff] %v613_v17 }
 0x195   : > { %v664_v34 = vld [vmem:[%s2304_s0 + $0x78] sm:$0xff]  ;;  %v663_v35 = vld [vmem:[%s2304_s0 + $0x70] sm:$0xff]  ;;  %v662_v36 = vld [vmem:[%s2304_s0 + $0x68] sm:$0xff] }
 0x196   : > { %1231 = vmatpush.msra.mxu2 %v664_v34  ;;  %1232 = vmatpush.msra.mxu3 %v664_v34  ;;  %v661_v37 = vld [vmem:[%s2304_s0 + $0x60] sm:$0xff]  ;;  %v660_v38 = vld [vmem:[%s2304_s0 + $0x58] sm:$0xff]  ;;  %v659_v39 = vld [vmem:[%s2304_s0 + $0x50] sm:$0xff] }
 0x197   : > { %665 = vmatpush.msra.mxu0 %v664_v34  ;;  %1230 = vmatpush.msra.mxu1 %v664_v34  ;;  %v658_v40 = vld [vmem:[%s2304_s0 + $0x48] sm:$0xff]  ;;  %v657_v41 = vld [vmem:[%s2304_s0 + $0x40] sm:$0xff]  ;;  %v656_v42 = vld [vmem:[%s2304_s0 + $0x38] sm:$0xff] }
 0x198   : > { %1234 = vmatpush.msra.mxu2 %v663_v35  ;;  %1235 = vmatpush.msra.mxu3 %v663_v35  ;;  %v655_v43 = vld [vmem:[%s2304_s0 + $0x30] sm:$0xff]  ;;  %v654_v44 = vld [vmem:[%s2304_s0 + $0x28] sm:$0xff]  ;;  %v653_v45 = vld [vmem:[%s2304_s0 + $0x20] sm:$0xff] }
 0x199   : > { %666 = vmatpush.msra.mxu0 %v663_v35  ;;  %1233 = vmatpush.msra.mxu1 %v663_v35  ;;  %v652_v46 = vld [vmem:[%s2304_s0 + $0x18] sm:$0xff]  ;;  %v651_v47 = vld [vmem:[%s2304_s0 + $0x10] sm:$0xff]  ;;  %v650_v48 = vld [vmem:[%s2304_s0 + $0x8] sm:$0xff] }
 0x19a   : > { %1237 = vmatpush.msra.mxu2 %v662_v36  ;;  %1238 = vmatpush.msra.mxu3 %v662_v36  ;;  %v649_v49 = vld [vmem:[%s2304_s0] sm:$0xff]  ;;  %v642_v52 = vld [vmem:[#allocation3 + $0x78] sm:$0xff]  ;;  %v635_v58 = vld [vmem:[#allocation3 + $0x10] sm:$0xff] }
 0x19b   : > { %667 = vmatpush.msra.mxu0 %v662_v36  ;;  %1236 = vmatpush.msra.mxu1 %v662_v36  ;;  %v646_v53 = vld [vmem:[#allocation3 + $0x8] sm:$0xff]  ;;  %v639_v59 = vld [vmem:[#allocation3 + $0x70] sm:$0xff]  ;;  %v643_v0 = vld [vmem:[#allocation3 + $0x18] sm:$0xff] }
 0x19c   : > { %1240 = vmatpush.msra.mxu2 %v661_v37  ;;  %1241 = vmatpush.msra.mxu3 %v661_v37  ;;  %v647_v1 = vld [vmem:[#allocation3 + $0x60] sm:$0xff]  ;;  %v640_v7 = vld [vmem:[#allocation3 + $0x38] sm:$0xff]  ;;  %v648_v13 = vld [vmem:[#allocation3 + $0x50] sm:$0xff] }
 0x19d   : > { %668 = vmatpush.msra.mxu0 %v661_v37  ;;  %1239 = vmatpush.msra.mxu1 %v661_v37  ;;  %v636_v6 = vld [vmem:[#allocation3 + $0x40] sm:$0xff]  ;;  %v644_v12 = vld [vmem:[#allocation3 + $0x58] sm:$0xff] }
 0x19e   : > { %1243 = vmatpush.msra.mxu2 %v660_v38  ;;  %1244 = vmatpush.msra.mxu3 %v660_v38 }
 0x19f   : > { %669 = vmatpush.msra.mxu0 %v660_v38  ;;  %1242 = vmatpush.msra.mxu1 %v660_v38 }
 0x1a0   : > { %1246 = vmatpush.msra.mxu2 %v659_v39  ;;  %1247 = vmatpush.msra.mxu3 %v659_v39 }
 0x1a1   : > { %670 = vmatpush.msra.mxu0 %v659_v39  ;;  %1245 = vmatpush.msra.mxu1 %v659_v39 }
 0x1a2   : > { %1249 = vmatpush.msra.mxu2 %v658_v40  ;;  %1250 = vmatpush.msra.mxu3 %v658_v40 }
 0x1a3   : > { %671 = vmatpush.msra.mxu0 %v658_v40  ;;  %1248 = vmatpush.msra.mxu1 %v658_v40 }
 0x1a4   : > { %1252 = vmatpush.msra.mxu2 %v657_v41  ;;  %1253 = vmatpush.msra.mxu3 %v657_v41 }
 0x1a5   : > { %672 = vmatpush.msra.mxu0 %v657_v41  ;;  %1251 = vmatpush.msra.mxu1 %v657_v41 }
 0x1a6   : > { %1255 = vmatpush.msra.mxu2 %v656_v42  ;;  %1256 = vmatpush.msra.mxu3 %v656_v42 }
 0x1a7   : > { %673 = vmatpush.msra.mxu0 %v656_v42  ;;  %1254 = vmatpush.msra.mxu1 %v656_v42 }
 0x1a8   : > { %1258 = vmatpush.msra.mxu2 %v655_v43  ;;  %1259 = vmatpush.msra.mxu3 %v655_v43 }
 0x1a9   : > { %674 = vmatpush.msra.mxu0 %v655_v43  ;;  %1257 = vmatpush.msra.mxu1 %v655_v43 }
 0x1aa   : > { %1261 = vmatpush.msra.mxu2 %v654_v44  ;;  %1262 = vmatpush.msra.mxu3 %v654_v44 }
 0x1ab   : > { %675 = vmatpush.msra.mxu0 %v654_v44  ;;  %1260 = vmatpush.msra.mxu1 %v654_v44 }
 0x1ac   : > { %1264 = vmatpush.msra.mxu2 %v653_v45  ;;  %1265 = vmatpush.msra.mxu3 %v653_v45 }
 0x1ad   : > { %676 = vmatpush.msra.mxu0 %v653_v45  ;;  %1263 = vmatpush.msra.mxu1 %v653_v45 }
 0x1ae   : > { %1267 = vmatpush.msra.mxu2 %v652_v46  ;;  %1268 = vmatpush.msra.mxu3 %v652_v46 }
 0x1af   : > { %677 = vmatpush.msra.mxu0 %v652_v46  ;;  %1266 = vmatpush.msra.mxu1 %v652_v46 }
 0x1b0   : > { %1270 = vmatpush.msra.mxu2 %v651_v47  ;;  %1271 = vmatpush.msra.mxu3 %v651_v47 }
 0x1b1   : > { %678 = vmatpush.msra.mxu0 %v651_v47  ;;  %1269 = vmatpush.msra.mxu1 %v651_v47 }
 0x1b2   : > { %1273 = vmatpush.msra.mxu2 %v650_v48  ;;  %1274 = vmatpush.msra.mxu3 %v650_v48 }
 0x1b3   : > { %679 = vmatpush.msra.mxu0 %v650_v48  ;;  %1272 = vmatpush.msra.mxu1 %v650_v48 }
 0x1b4   : > { %1276 = vmatpush.msra.mxu2 %v649_v49  ;;  %1277 = vmatpush.msra.mxu3 %v649_v49 }
 0x1b5   : > { %705 = vmatmul.f32.vlgmr.msra.gmra.mxu2 %v2345_v18  ;;  %717 = vmatmul.f32.vlgmr.msra.gmra.mxu3 %v2348_v19  ;;  %v633_v18 = vld [vmem:[#allocation3 + $0x28] sm:$0xff] }
 0x1b6   : > { %680 = vmatpush.msra.mxu0 %v649_v49  ;;  %1275 = vmatpush.msra.mxu1 %v649_v49  ;;  %v637_v19 = vld [vmem:[#allocation3 + $0x48] sm:$0xff] }
 0x1b7   : > { %681 = vmatmul.f32.vlgmr.msra.gmra.mxu0 %v2351_v20  ;;  %693 = vmatmul.f32.vlgmr.msra.gmra.mxu1 %v2354_v21 }
 0x1bd   : > { %708 = vmatmul.f32.gmra.mxu2 %v2361_v22  ;;  %720 = vmatmul.f32.gmra.mxu3 %v2364_v23 }
 0x1bf   : > { %684 = vmatmul.f32.gmra.mxu0 %v2367_v24  ;;  %696 = vmatmul.f32.gmra.mxu1 %v2370_v25  ;;  %v641_v24 = vld [vmem:[#allocation3 + $0x20] sm:$0xff] }
 0x1c0   : > { %v645_v25 = vld [vmem:[#allocation3] sm:$0xff] }
 0x1c5   : > { %711 = vmatmul.f32.gmra.mxu2 %v2377_v26  ;;  %723 = vmatmul.f32.gmra.mxu3 %v2380_v27 }
 0x1c7   : > { %687 = vmatmul.f32.gmra.mxu0 %v2383_v28  ;;  %699 = vmatmul.f32.gmra.mxu1 %v2386_v29 }
 0x1cd   : > { %714 = vmatmul.f32.gmra.mxu2 %v2393_v30  ;;  %726 = vmatmul.f32.gmra.mxu3 %v2396_v31  ;;  %v634_v30 = vld [vmem:[#allocation3 + $0x68] sm:$0xff]  ;;  %v638_v31 = vld [vmem:[#allocation3 + $0x30] sm:$0xff] }
 0x1cf   : > { %690 = vmatmul.f32.gmra.mxu0 %v2399_v32  ;;  %702 = vmatmul.f32.gmra.mxu1 %v2402_v33 }
 0x234   : > { %v682_v20 = vpop.f32.mrf.mxu0  ;;  %v694_v21 = vpop.f32.mrf.mxu1 }
 0x235   : > { %v730_v22 = vadd.f32 %v682_v20, %v633_v18  ;;  %v734_v23 = vadd.f32 %v694_v21, %v637_v19 }
 0x237   : > { %746 = vst [vmem:[#allocation3 + $0x28] sm:$0xff] %v730_v22 }
 0x238   : > { %750 = vst [vmem:[#allocation3 + $0x48] sm:$0xff] %v734_v23  ;;  %v706_v26 = vpop.f32.mrf.mxu2  ;;  %v718_v27 = vpop.f32.mrf.mxu3 }
 0x239   : > { %v738_v28 = vadd.f32 %v706_v26, %v641_v24  ;;  %v742_v29 = vadd.f32 %v718_v27, %v645_v25 }
 0x23b   : > { %754 = vst [vmem:[#allocation3 + $0x20] sm:$0xff] %v738_v28 }
 0x23c   : > { %758 = vst [vmem:[#allocation3] sm:$0xff] %v742_v29  ;;  %v685_v32 = vpop.f32.mrf.mxu0  ;;  %v697_v33 = vpop.f32.mrf.mxu1 }
 0x23d   : > { %v731_v50 = vadd.f32 %v685_v32, %v634_v30  ;;  %v735_v51 = vadd.f32 %v697_v33, %v638_v31 }
 0x23f   : > { %747 = vst [vmem:[#allocation3 + $0x68] sm:$0xff] %v731_v50 }
 0x240   : > { %751 = vst [vmem:[#allocation3 + $0x30] sm:$0xff] %v735_v51  ;;  %v709_v54 = vpop.f32.mrf.mxu2  ;;  %v721_v55 = vpop.f32.mrf.mxu3 }
 0x241   : > { %v739_v56 = vadd.f32 %v709_v54, %v642_v52  ;;  %v743_v57 = vadd.f32 %v721_v55, %v646_v53 }
 0x243   : > { %755 = vst [vmem:[#allocation3 + $0x78] sm:$0xff] %v739_v56 }
 0x244   : > { %759 = vst [vmem:[#allocation3 + $0x8] sm:$0xff] %v743_v57  ;;  %v688_v60 = vpop.f32.mrf.mxu0  ;;  %v700_v61 = vpop.f32.mrf.mxu1 }
 0x245   : > { %v732_v62 = vadd.f32 %v688_v60, %v635_v58  ;;  %v736_v63 = vadd.f32 %v700_v61, %v639_v59 }
 0x247   : > { %748 = vst [vmem:[#allocation3 + $0x10] sm:$0xff] %v732_v62 }
 0x248   : > { %752 = vst [vmem:[#allocation3 + $0x70] sm:$0xff] %v736_v63  ;;  %v712_v2 = vpop.f32.mrf.mxu2  ;;  %v724_v3 = vpop.f32.mrf.mxu3 }
 0x249   : > { %v740_v4 = vadd.f32 %v712_v2, %v643_v0  ;;  %v744_v5 = vadd.f32 %v724_v3, %v647_v1 }
 0x24b   : > { %756 = vst [vmem:[#allocation3 + $0x18] sm:$0xff] %v740_v4 }
 0x24c   : > { %760 = vst [vmem:[#allocation3 + $0x60] sm:$0xff] %v744_v5  ;;  %v691_v8 = vpop.f32.mrf.mxu0  ;;  %v703_v9 = vpop.f32.mrf.mxu1 }
 0x24d   : > { %v733_v10 = vadd.f32 %v691_v8, %v636_v6  ;;  %v737_v11 = vadd.f32 %v703_v9, %v640_v7 }
 0x24f   : > { %749 = vst [vmem:[#allocation3 + $0x40] sm:$0xff] %v733_v10 }
 0x250   : > { %753 = vst [vmem:[#allocation3 + $0x38] sm:$0xff] %v737_v11  ;;  %v715_v14 = vpop.f32.mrf.mxu2  ;;  %v727_v15 = vpop.f32.mrf.mxu3 }
 0x251   : > { %v741_v16 = vadd.f32 %v715_v14, %v644_v12  ;;  %v745_v17 = vadd.f32 %v727_v15, %v648_v13 }
 0x253   : > { %757 = vst [vmem:[#allocation3 + $0x58] sm:$0xff] %v741_v16 }
 0x254   : > { %761 = vst [vmem:[#allocation3 + $0x50] sm:$0xff] %v745_v17 }
 0x255 PF: > { %s2680_s12 = sld [smem:[#allocation27_spill]] }
 0x256   : > { %s2681_s1 = sld [smem:[#allocation28_spill]] }
 0x25b   : > { %p762_p5 = scmp.eq.s32.totalorder %s2680_s12, 1 }
 0x25c   : > { %p765_p2 = scmp.gt.s32.totalorder %s2681_s1, 0 }
 0x25d   : > { %p763_p8 = pnand %p762_p5, %p464_p13 }
 0x25e   : > { %p766_p12 = pnand %p765_p2, %p440_p6 }
 0x25f   : > { %p764_p0 = pneg %p763_p8 }
 0x260   : > { %p767_p4 = pneg %p766_p12 }
 0x262   : > { %p768_p1 = por %p767_p4, %p764_p0 }
 0x263   : > { %v819_v34 = vld [vmem:[%s2310_s8 + $0x78] sm:$0xff] (%p768_p1)  ;;  %v818_v35 = vld [vmem:[%s2310_s8 + $0x70] sm:$0xff] (%p768_p1)  ;;  %v817_v36 = vld [vmem:[%s2310_s8 + $0x68] sm:$0xff] (%p768_p1) }
 0x264   : > { %771 = sbr.rel (!%p768_p1) target bundleno = 803 (0x323), region = 76  ;;  %1279 = vmatpush.msra.mxu2 (%p768_p1), %v819_v34  ;;  %1280 = vmatpush.msra.mxu3 (%p768_p1), %v819_v34  ;;  %v816_v37 = vld [vmem:[%s2310_s8 + $0x60] sm:$0xff] (%p768_p1)  ;;  %v815_v38 = vld [vmem:[%s2310_s8 + $0x58] sm:$0xff] (%p768_p1)  ;;  %v814_v39 = vld [vmem:[%s2310_s8 + $0x50] sm:$0xff] (%p768_p1) }
 0x265   : > { %820 = vmatpush.msra.mxu0 (%p768_p1), %v819_v34  ;;  %1278 = vmatpush.msra.mxu1 (%p768_p1), %v819_v34  ;;  %v813_v40 = vld [vmem:[%s2310_s8 + $0x48] sm:$0xff] (%p768_p1)  ;;  %v812_v41 = vld [vmem:[%s2310_s8 + $0x40] sm:$0xff] (%p768_p1)  ;;  %v811_v42 = vld [vmem:[%s2310_s8 + $0x38] sm:$0xff] (%p768_p1) }
 0x266   : > { %1282 = vmatpush.msra.mxu2 (%p768_p1), %v818_v35  ;;  %1283 = vmatpush.msra.mxu3 (%p768_p1), %v818_v35  ;;  %v810_v43 = vld [vmem:[%s2310_s8 + $0x30] sm:$0xff] (%p768_p1)  ;;  %v809_v44 = vld [vmem:[%s2310_s8 + $0x28] sm:$0xff] (%p768_p1)  ;;  %v808_v45 = vld [vmem:[%s2310_s8 + $0x20] sm:$0xff] (%p768_p1) }
 0x267   : > { %821 = vmatpush.msra.mxu0 (%p768_p1), %v818_v35  ;;  %1281 = vmatpush.msra.mxu1 (%p768_p1), %v818_v35  ;;  %v807_v46 = vld [vmem:[%s2310_s8 + $0x18] sm:$0xff] (%p768_p1)  ;;  %v806_v47 = vld [vmem:[%s2310_s8 + $0x10] sm:$0xff] (%p768_p1)  ;;  %v805_v48 = vld [vmem:[%s2310_s8 + $0x8] sm:$0xff] (%p768_p1) }
 0x268   : > { %1285 = vmatpush.msra.mxu2 (%p768_p1), %v817_v36  ;;  %1286 = vmatpush.msra.mxu3 (%p768_p1), %v817_v36  ;;  %v804_v49 = vld [vmem:[%s2310_s8] sm:$0xff] (%p768_p1)  ;;  %v797_v22 = vld [vmem:[#allocation3 + $0x78] sm:$0xff] (%p768_p1)  ;;  %v793_v25 = vld [vmem:[#allocation3 + $0x30] sm:$0xff] (%p768_p1) }
 0x269   : > { %822 = vmatpush.msra.mxu0 %v817_v36  ;;  %1284 = vmatpush.msra.mxu1 %v817_v36  ;;  %v796_v18 = vld [vmem:[#allocation3 + $0x20] sm:$0xff]  ;;  %v788_v20 = vld [vmem:[#allocation3 + $0x28] sm:$0xff]  ;;  %v798_v26 = vld [vmem:[#allocation3 + $0x18] sm:$0xff] }
 0x26a   : > { %1288 = vmatpush.msra.mxu2 %v816_v37  ;;  %1289 = vmatpush.msra.mxu3 %v816_v37  ;;  %v800_v19 = vld [vmem:[#allocation3] sm:$0xff]  ;;  %v792_v21 = vld [vmem:[#allocation3 + $0x48] sm:$0xff]  ;;  %v790_v28 = vld [vmem:[#allocation3 + $0x10] sm:$0xff] }
 0x26b   : > { %823 = vmatpush.msra.mxu0 %v816_v37  ;;  %1287 = vmatpush.msra.mxu1 %v816_v37  ;;  %v801_v23 = vld [vmem:[#allocation3 + $0x8] sm:$0xff]  ;;  %v802_v27 = vld [vmem:[#allocation3 + $0x60] sm:$0xff]  ;;  %v794_v29 = vld [vmem:[#allocation3 + $0x70] sm:$0xff] }
 0x26c   : > { %1291 = vmatpush.msra.mxu2 %v815_v38  ;;  %1292 = vmatpush.msra.mxu3 %v815_v38  ;;  %v789_v24 = vld [vmem:[#allocation3 + $0x68] sm:$0xff]  ;;  %v799_v30 = vld [vmem:[#allocation3 + $0x58] sm:$0xff]  ;;  %v803_v31 = vld [vmem:[#allocation3 + $0x50] sm:$0xff] }
 0x26d   : > { %824 = vmatpush.msra.mxu0 %v815_v38  ;;  %1290 = vmatpush.msra.mxu1 %v815_v38  ;;  %v791_v32 = vld [vmem:[#allocation3 + $0x40] sm:$0xff]  ;;  %v795_v33 = vld [vmem:[#allocation3 + $0x38] sm:$0xff]  ;;  %v772_v50 = vld [vmem:[#allocation2 + $0x30] sm:$0xff] }
 0x26e   : > { %1294 = vmatpush.msra.mxu2 %v814_v39  ;;  %1295 = vmatpush.msra.mxu3 %v814_v39  ;;  %v776_v51 = vld [vmem:[#allocation2 + $0x50] sm:$0xff]  ;;  %v780_v56 = vld [vmem:[#allocation2 + $0x40] sm:$0xff]  ;;  %v777_v63 = vld [vmem:[#allocation2 + $0x68] sm:$0xff] }
 0x26f   : > { %825 = vmatpush.msra.mxu0 %v814_v39  ;;  %1293 = vmatpush.msra.mxu1 %v814_v39  ;;  %v784_v57 = vld [vmem:[#allocation2 + $0x60] sm:$0xff]  ;;  %v785_v5 = vld [vmem:[#allocation2 + $0x70] sm:$0xff]  ;;  %v774_v10 = vld [vmem:[#allocation2 + $0x58] sm:$0xff] }
 0x270   : > { %1297 = vmatpush.msra.mxu2 %v813_v40  ;;  %1298 = vmatpush.msra.mxu3 %v813_v40  ;;  %v773_v62 = vld [vmem:[#allocation2] sm:$0xff]  ;;  %v778_v11 = vld [vmem:[#allocation2 + $0x8] sm:$0xff]  ;;  %v782_v16 = vld [vmem:[#allocation2 + $0x10] sm:$0xff] }
 0x271   : > { %826 = vmatpush.msra.mxu0 %v813_v40  ;;  %1296 = vmatpush.msra.mxu1 %v813_v40  ;;  %v781_v4 = vld [vmem:[#allocation2 + $0x20] sm:$0xff]  ;;  %v786_v17 = vld [vmem:[#allocation2 + $0x78] sm:$0xff]  ;;  %v779_v39 = vld [vmem:[#allocation2 + $0x48] sm:$0xff] }
 0x272   : > { %1300 = vmatpush.msra.mxu2 %v812_v41  ;;  %1301 = vmatpush.msra.mxu3 %v812_v41  ;;  %v775_v38 = vld [vmem:[#allocation2 + $0x18] sm:$0xff] }
 0x273   : > { %827 = vmatpush.msra.mxu0 %v812_v41  ;;  %1299 = vmatpush.msra.mxu1 %v812_v41 }
 0x274   : > { %1303 = vmatpush.msra.mxu2 %v811_v42  ;;  %1304 = vmatpush.msra.mxu3 %v811_v42 }
 0x275   : > { %828 = vmatpush.msra.mxu0 %v811_v42  ;;  %1302 = vmatpush.msra.mxu1 %v811_v42 }
 0x276   : > { %1306 = vmatpush.msra.mxu2 %v810_v43  ;;  %1307 = vmatpush.msra.mxu3 %v810_v43 }
 0x277   : > { %829 = vmatpush.msra.mxu0 %v810_v43  ;;  %1305 = vmatpush.msra.mxu1 %v810_v43 }
 0x278   : > { %1309 = vmatpush.msra.mxu2 %v809_v44  ;;  %1310 = vmatpush.msra.mxu3 %v809_v44 }
 0x279   : > { %830 = vmatpush.msra.mxu0 %v809_v44  ;;  %1308 = vmatpush.msra.mxu1 %v809_v44  ;;  %v783_v44 = vld [vmem:[#allocation2 + $0x38] sm:$0xff] }
 0x27a   : > { %1312 = vmatpush.msra.mxu2 %v808_v45  ;;  %1313 = vmatpush.msra.mxu3 %v808_v45 }
 0x27b   : > { %831 = vmatpush.msra.mxu0 %v808_v45  ;;  %1311 = vmatpush.msra.mxu1 %v808_v45  ;;  %v787_v45 = vld [vmem:[#allocation2 + $0x28] sm:$0xff] }
 0x27c   : > { %1315 = vmatpush.msra.mxu2 %v807_v46  ;;  %1316 = vmatpush.msra.mxu3 %v807_v46 }
 0x27d   : > { %832 = vmatpush.msra.mxu0 %v807_v46  ;;  %1314 = vmatpush.msra.mxu1 %v807_v46 }
 0x27e   : > { %1318 = vmatpush.msra.mxu2 %v806_v47  ;;  %1319 = vmatpush.msra.mxu3 %v806_v47 }
 0x27f   : > { %833 = vmatpush.msra.mxu0 %v806_v47  ;;  %1317 = vmatpush.msra.mxu1 %v806_v47 }
 0x280   : > { %1321 = vmatpush.msra.mxu2 %v805_v48  ;;  %1322 = vmatpush.msra.mxu3 %v805_v48 }
 0x281   : > { %834 = vmatpush.msra.mxu0 %v805_v48  ;;  %1320 = vmatpush.msra.mxu1 %v805_v48 }
 0x282   : > { %1324 = vmatpush.msra.mxu2 %v804_v49  ;;  %1325 = vmatpush.msra.mxu3 %v804_v49 }
 0x283   : > { %860 = vmatmul.f32.vlgmr.msra.gmra.mxu2 %v796_v18  ;;  %872 = vmatmul.f32.vlgmr.msra.gmra.mxu3 %v800_v19 }
 0x284   : > { %835 = vmatpush.msra.mxu0 %v804_v49  ;;  %1323 = vmatpush.msra.mxu1 %v804_v49 }
 0x285   : > { %836 = vmatmul.f32.vlgmr.msra.gmra.mxu0 %v788_v20  ;;  %848 = vmatmul.f32.vlgmr.msra.gmra.mxu1 %v792_v21 }
 0x28b   : > { %863 = vmatmul.f32.gmra.mxu2 %v797_v22  ;;  %875 = vmatmul.f32.gmra.mxu3 %v801_v23 }
 0x28d   : > { %839 = vmatmul.f32.gmra.mxu0 %v789_v24  ;;  %851 = vmatmul.f32.gmra.mxu1 %v793_v25 }
 0x293   : > { %866 = vmatmul.f32.gmra.mxu2 %v798_v26  ;;  %878 = vmatmul.f32.gmra.mxu3 %v802_v27 }
 0x295   : > { %842 = vmatmul.f32.gmra.mxu0 %v790_v28  ;;  %854 = vmatmul.f32.gmra.mxu1 %v794_v29 }
 0x29b   : > { %869 = vmatmul.f32.gmra.mxu2 %v799_v30  ;;  %881 = vmatmul.f32.gmra.mxu3 %v803_v31 }
 0x29d   : > { %845 = vmatmul.f32.gmra.mxu0 %v791_v32  ;;  %857 = vmatmul.f32.gmra.mxu1 %v795_v33 }
 0x302   : > { %v837_v52 = vpop.f32.mrf.mxu0  ;;  %v849_v53 = vpop.f32.mrf.mxu1 }
 0x303   : > { %v885_v54 = vadd.f32 %v837_v52, %v772_v50  ;;  %v889_v55 = vadd.f32 %v849_v53, %v776_v51 }
 0x305   : > { %901 = vst [vmem:[#allocation2 + $0x30] sm:$0xff] %v885_v54 }
 0x306   : > { %905 = vst [vmem:[#allocation2 + $0x50] sm:$0xff] %v889_v55  ;;  %v861_v58 = vpop.f32.mrf.mxu2  ;;  %v873_v59 = vpop.f32.mrf.mxu3 }
 0x307   : > { %v893_v60 = vadd.f32 %v861_v58, %v780_v56  ;;  %v897_v61 = vadd.f32 %v873_v59, %v784_v57 }
 0x309   : > { %909 = vst [vmem:[#allocation2 + $0x40] sm:$0xff] %v893_v60 }
 0x30a   : > { %913 = vst [vmem:[#allocation2 + $0x60] sm:$0xff] %v897_v61  ;;  %v840_v0 = vpop.f32.mrf.mxu0  ;;  %v852_v1 = vpop.f32.mrf.mxu1 }
 0x30b   : > { %v886_v2 = vadd.f32 %v840_v0, %v773_v62  ;;  %v890_v3 = vadd.f32 %v852_v1, %v777_v63 }
 0x30d   : > { %902 = vst [vmem:[#allocation2] sm:$0xff] %v886_v2 }
 0x30e   : > { %906 = vst [vmem:[#allocation2 + $0x68] sm:$0xff] %v890_v3  ;;  %v864_v6 = vpop.f32.mrf.mxu2  ;;  %v876_v7 = vpop.f32.mrf.mxu3 }
 0x30f   : > { %v894_v8 = vadd.f32 %v864_v6, %v781_v4  ;;  %v898_v9 = vadd.f32 %v876_v7, %v785_v5 }
 0x311   : > { %910 = vst [vmem:[#allocation2 + $0x20] sm:$0xff] %v894_v8 }
 0x312   : > { %914 = vst [vmem:[#allocation2 + $0x70] sm:$0xff] %v898_v9  ;;  %v843_v12 = vpop.f32.mrf.mxu0  ;;  %v855_v13 = vpop.f32.mrf.mxu1 }
 0x313   : > { %v887_v14 = vadd.f32 %v843_v12, %v774_v10  ;;  %v891_v15 = vadd.f32 %v855_v13, %v778_v11 }
 0x315   : > { %903 = vst [vmem:[#allocation2 + $0x58] sm:$0xff] %v887_v14 }
 0x316   : > { %907 = vst [vmem:[#allocation2 + $0x8] sm:$0xff] %v891_v15  ;;  %v867_v34 = vpop.f32.mrf.mxu2  ;;  %v879_v35 = vpop.f32.mrf.mxu3 }
 0x317   : > { %v895_v36 = vadd.f32 %v867_v34, %v782_v16  ;;  %v899_v37 = vadd.f32 %v879_v35, %v786_v17 }
 0x319   : > { %911 = vst [vmem:[#allocation2 + $0x10] sm:$0xff] %v895_v36 }
 0x31a   : > { %915 = vst [vmem:[#allocation2 + $0x78] sm:$0xff] %v899_v37  ;;  %v846_v40 = vpop.f32.mrf.mxu0  ;;  %v858_v41 = vpop.f32.mrf.mxu1 }
 0x31b   : > { %v888_v42 = vadd.f32 %v846_v40, %v775_v38  ;;  %v892_v43 = vadd.f32 %v858_v41, %v779_v39 }
 0x31d   : > { %904 = vst [vmem:[#allocation2 + $0x18] sm:$0xff] %v888_v42 }
 0x31e   : > { %908 = vst [vmem:[#allocation2 + $0x48] sm:$0xff] %v892_v43  ;;  %v870_v46 = vpop.f32.mrf.mxu2  ;;  %v882_v47 = vpop.f32.mrf.mxu3 }
 0x31f   : > { %v896_v48 = vadd.f32 %v870_v46, %v783_v44  ;;  %v900_v49 = vadd.f32 %v882_v47, %v787_v45 }
 0x321   : > { %912 = vst [vmem:[#allocation2 + $0x38] sm:$0xff] %v896_v48 }
 0x322   : > { %916 = vst [vmem:[#allocation2 + $0x28] sm:$0xff] %v900_v49 }
 0x323 PF: > { %s2682_s28 = sld [smem:[#allocation27_spill]] }
 0x329   : > { %p1173_p6 = scmp.ne.s32.totalorder %s2682_s28, 1 }
 0x32b   : > { %919 = sbr.rel (%p1173_p6) target bundleno = 833 (0x341), region = 80 }
 0x330   : > { %v920_v18 = vld [vmem:[#allocation2 + $0x30] sm:$0xff]  ;;  %v921_v19 = vld [vmem:[#allocation2] sm:$0xff]  ;;  %v922_v20 = vld [vmem:[#allocation2 + $0x58] sm:$0xff] }
 0x331   : > { %936 = vst [vmem:[%s2320_s13] sm:$0xff] %v920_v18  ;;  %v923_v21 = vld [vmem:[#allocation2 + $0x18] sm:$0xff]  ;;  %v924_v22 = vld [vmem:[#allocation2 + $0x50] sm:$0xff]  ;;  %v925_v23 = vld [vmem:[#allocation2 + $0x68] sm:$0xff] }
 0x332   : > { %937 = vst [vmem:[%s2320_s13 + $0x8] sm:$0xff] %v921_v19  ;;  %v926_v24 = vld [vmem:[#allocation2 + $0x8] sm:$0xff]  ;;  %v928_v26 = vld [vmem:[#allocation2 + $0x40] sm:$0xff]  ;;  %v930_v28 = vld [vmem:[#allocation2 + $0x10] sm:$0xff] }
 0x333   : > { %938 = vst [vmem:[%s2320_s13 + $0x10] sm:$0xff] %v922_v20  ;;  %v927_v25 = vld [vmem:[#allocation2 + $0x48] sm:$0xff]  ;;  %v929_v27 = vld [vmem:[#allocation2 + $0x20] sm:$0xff]  ;;  %v931_v29 = vld [vmem:[#allocation2 + $0x38] sm:$0xff] }
 0x334   : > { %939 = vst [vmem:[%s2320_s13 + $0x18] sm:$0xff] %v923_v21  ;;  %v932_v30 = vld [vmem:[#allocation2 + $0x60] sm:$0xff]  ;;  %v933_v31 = vld [vmem:[#allocation2 + $0x70] sm:$0xff]  ;;  %v934_v32 = vld [vmem:[#allocation2 + $0x78] sm:$0xff] }
 0x335   : > { %940 = vst [vmem:[%s2320_s13 + $0x20] sm:$0xff] %v924_v22  ;;  %v935_v33 = vld [vmem:[#allocation2 + $0x28] sm:$0xff] }
 0x336   : > { %941 = vst [vmem:[%s2320_s13 + $0x28] sm:$0xff] %v925_v23 }
 0x337   : > { %942 = vst [vmem:[%s2320_s13 + $0x30] sm:$0xff] %v926_v24 }
 0x338   : > { %943 = vst [vmem:[%s2320_s13 + $0x38] sm:$0xff] %v927_v25 }
 0x339   : > { %944 = vst [vmem:[%s2320_s13 + $0x40] sm:$0xff] %v928_v26 }
 0x33a   : > { %945 = vst [vmem:[%s2320_s13 + $0x48] sm:$0xff] %v929_v27 }
 0x33b   : > { %946 = vst [vmem:[%s2320_s13 + $0x50] sm:$0xff] %v930_v28 }
 0x33c   : > { %947 = vst [vmem:[%s2320_s13 + $0x58] sm:$0xff] %v931_v29 }
 0x33d   : > { %948 = vst [vmem:[%s2320_s13 + $0x60] sm:$0xff] %v932_v30 }
 0x33e   : > { %949 = vst [vmem:[%s2320_s13 + $0x68] sm:$0xff] %v933_v31 }
 0x33f   : > { %950 = vst [vmem:[%s2320_s13 + $0x70] sm:$0xff] %v934_v32 }
 0x340   : > { %951 = vst [vmem:[%s2320_s13 + $0x78] sm:$0xff] %v935_v33 }
 0x341 PF: > { %s2683_s30 = sld [smem:[#allocation29_spill]]  ;;  %s967_s2 = sshll.u32 %s2320_s13, 4  ;;  %s968_s2 = int_to_ptr.vmem [resolvable:$true] %s967_s2 }
 0x342   : > { %s2684_s4 = sld [smem:[#allocation28_spill]]  ;;  %s953_s20 = scalar_lea.sflag [#allocation6], %s431_s9 }
 0x343   : > { %s2685_s21 = sld [smem:[#allocation49_spill]] }
 0x347   : > { %s1327_s17 = smul.u32 48, %s2683_s30 }
 0x349   : > { %s964_s15 = sadd.s32 %s2684_s4, %s1327_s17  ;;  %s2686_s0 = smov %s2685_s21 }
 0x34a   : > { %s1177_s5 = sshll.u32 %s964_s15, 3  ;;  %s1717_s16 = scalar_lea.hbm %s2686_s0, 768 }
 0x34b   : > { %s966_s11 = scalar_lea.hbm %s2685_s21, %s1177_s5 }
 0x34c   : > { %s969_s8 = sshll.u32 %s966_s11, 4  ;;  %s970_s8 = int_to_ptr.hbm [resolvable:$true] %s969_s8 }
 0x34d   : > { %s1711_s23 = sshra.s32 %s970_s8, 4  ;;  %s1712_s23 = int_to_ptr.hbm [resolvable:$true] %s1711_s23 }
 0x34e   : > { %s1713_s10 = scalar_lea.hbm %s1712_s23, 128  ;;  %p1718_p3 = scmp.lt.s32.totalorder %s1712_s23, %s2686_s0 }
 0x34f   : > { %p1714_p11 = scmp.ne.s32.totalorder %s1712_s23, %s1713_s10  ;;  %p1719_p5 = scmp.lt.s32.totalorder %s1717_s16, %s1713_s10 }
 0x351   : > { %p1715_p13 = pnand %p1714_p11, %p2222_p9  ;;  %p1720_p2 = por %p1719_p5, %p1718_p3 }
 0x353   : > { %p1716_p7 = pneg %p1715_p13 }
 0x355   : > { %p1721_p8 = pnand %p1720_p2, %p1716_p7 }
 0x357   : > { %1724 = shalt.err (!%p1721_p8)
}
 0x358   : > { %s1930_s9 = smov 128   ;;  %s1931_s28 = smov 384  }
 0x359   : > { %s1932_s30 = smov 8  }
 0x35a   : > { %1338 = dma.vmem_to_hbm [thread:$0]  (%p2222_p9), %s968_s2, 2048, %s970_s8, %s953_s20, %s1930_s9, %s1931_s28, %s1932_s30  }
 0x35b PF: > { %p1361_p12 = scmp.ge.s32.totalorder %s1923_s14, 2  ;;  %s984_s4 = sand.u32 1, %s1839_s18  }
 0x35c   : > { %s985_s17 = scalar_lea.sflag [#allocation6], %s984_s4 }
 0x35d   : > { %p1357_p0 = pnand %p1361_p12, %p2226_p10 }
 0x35f   : > { %p1358_p4 = pneg %p1357_p0 }
 0x361   : > { %1834 = dma.done.wait (%p1358_p4), %s985_s17, 2048  }
 0x362   : > { %1836 = vsyncadd (%p1358_p4), %s985_s17, 4294965248  ;;  %s27_s14 = sadd.s32 1, %s1923_s14   ;;  %s2688_s22 = sld [smem:[#allocation20_spill]] }
 0x363   : > { %p2503_p1 = scmp.ge.s32.totalorder %s27_s14, 14   ;;  %s2689_s20 = sld [smem:[#allocation43_spill]] }
 0x364   : > { %s2690_s21 = sld [smem:[#allocation21_spill]]  ;;  %s2699_s18 = smov %s1843_s19 }
 0x365   : > { %s2691_s2 = sld [smem:[#allocation22_spill]]  ;;  %s2707_s25 = smov %s1871_s26 }
 0x366   : > { %s2692_s23 = sld [smem:[#allocation40_spill]]  ;;  %s2708_s26 = smov %s2253_s3 }
 0x367   : > { %s2693_s24 = sld [smem:[#allocation24_spill]]  ;;  %s2709_s30 = smov %s1891_s6 }
 0x368   : > { %s2694_s27 = sld [smem:[#allocation25_spill]]  ;;  %s2701_s19 = smov %s2688_s22 }
 0x369   : > { %s2695_s28 = sld [smem:[#allocation26_spill]]  ;;  %s2710_s6 = smov %s1895_s7 }
 0x36a   : > { %s2696_s29 = sld [smem:[#allocation39_spill]] }
 0x36b   : > { %s2697_s5 = sld [smem:[#allocation42_spill]]  ;;  %s2705_s22 = smov %s2691_s2 }
 0x36c   : > { %s2698_s8 = sld [smem:[#allocation30_spill]] }
 0x36d   : > { %s2700_s9 = sld [smem:[#allocation31_spill]]  ;;  %26 = sbr.rel (!%p2503_p1) target bundleno = 25 (0x19), region = 153 }
 0x36e   : > { %s2702_s10 = sld [smem:[#allocation32_spill]] }
 0x36f   : > { %s2703_s11 = sld [smem:[#allocation36_spill]] }
 0x370   : > { %s2704_s12 = sld [smem:[#allocation37_spill]] }
 0x371   : > { %s2706_s13 = sld [smem:[#allocation41_spill]]  ;;  %s2711_s7 = smov %s2697_s5 }
 0x372   :  { %991 = vsyncpa [#allocation5], 1 }
 0x373   :  { %993 = vsyncpa [#allocation5 + $0x1], 1 }
 0x374   :  { %994 = vsyncpa [#allocation8], 1 }
 0x375   :  { %996 = vsyncpa [#allocation8 + $0x1], 1 }
 0x376   :  { %997 = vsyncpa [#allocation11], 1 }
 0x377   :  { %999 = vsyncpa [#allocation11 + $0x1], 1 }
 0x378   :  { %1000 = vsyncpa [#allocation6], 1 }
 0x379   :  { %1002 = vsyncpa [#allocation6 + $0x1], 1 }

</bundles_post_ra>
